<compile_context>
chip_gen: v5e
topology: v5e:2x2
jax: 0.10.0
libtpu: 0.0.40
codegen_flags: <defaults>
</compile_context>

<pallas_src>
import functools
import math

import jax
import jax.numpy as jnp
import numpy as np
from jax.experimental import pallas as pl
from jax.experimental.pallas import tpu as pltpu

_VMEM_LIMIT = 32 * 1024 * 1024  # safe on v5e/v6e (128 MiB) and v7x (64 MiB physical)


def _pick_tile(dim, want):
    """Largest convenient tile: `want` if it divides dim, else the full dim."""
    if dim <= want:
        return dim
    if dim % want == 0:
        return want
    return dim  # TODO(synk): masked epilogue for large non-divisible dims


# ----------------------------------------------------------------------------
# Pallas kernels
# ----------------------------------------------------------------------------
def _linear_kernel(x_ref, w_ref, b_ref, o_ref, acc_ref, *, relu):
    """Tiled matmul with K-reduction accumulator; bias (+ ReLU) fused in epilogue."""
    @pl.when(pl.program_id(2) == 0)
    def _():
        acc_ref[...] = jnp.zeros_like(acc_ref)

    acc_ref[...] += jnp.dot(
        x_ref[...].astype(jnp.bfloat16),
        w_ref[...].astype(jnp.bfloat16),
        preferred_element_type=jnp.float32,
    )

    @pl.when(pl.program_id(2) == pl.num_programs(2) - 1)
    def _():
        y = acc_ref[...] + b_ref[...]
        if relu:
            y = jnp.maximum(y, 0.0)
        o_ref[...] = y.astype(o_ref.dtype)


def linear(x2d, w, b, relu=False, tm=256, tn=512, tk=512):
    """x2d: (M, K), w: (K, N), b: (N,) -> (M, N)."""
    M, K = x2d.shape
    N = w.shape[1]
    tm = _pick_tile(M, tm)
    tn = _pick_tile(N, tn)
    tk = _pick_tile(K, tk)
    return pl.pallas_call(
        functools.partial(_linear_kernel, relu=relu),
        out_shape=jax.ShapeDtypeStruct((M, N), jnp.float32),
        grid=(M // tm, N // tn, K // tk),
        in_specs=[
            pl.BlockSpec((tm, tk), lambda i, j, k: (i, k)),
            pl.BlockSpec((tk, tn), lambda i, j, k: (k, j)),
            pl.BlockSpec((1, tn), lambda i, j, k: (0, j)),
        ],
        out_specs=pl.BlockSpec((tm, tn), lambda i, j, k: (i, j)),
        scratch_shapes=[pltpu.VMEM((tm, tn), jnp.float32)],
        compiler_params=pltpu.CompilerParams(
            dimension_semantics=("parallel", "parallel", "arbitrary"),
            vmem_limit_bytes=_VMEM_LIMIT,
        ),
    )(x2d, w, b.reshape(1, N))


def _linear_add_ln_kernel(x_ref, w_ref, b_ref, r_ref, g_ref, bt_ref, o_ref, acc_ref, *, eps):
    """Tiled matmul fused with bias + residual-add + LayerNorm epilogue (full N per block)."""
    @pl.when(pl.program_id(1) == 0)
    def _():
        acc_ref[...] = jnp.zeros_like(acc_ref)

    acc_ref[...] += jnp.dot(
        x_ref[...].astype(jnp.bfloat16),
        w_ref[...].astype(jnp.bfloat16),
        preferred_element_type=jnp.float32,
    )

    @pl.when(pl.program_id(1) == pl.num_programs(1) - 1)
    def _():
        y = acc_ref[...] + b_ref[...] + r_ref[...]
        mu = jnp.mean(y, axis=-1, keepdims=True)
        var = jnp.mean((y - mu) ** 2, axis=-1, keepdims=True)
        o_ref[...] = (
            (y - mu) * jax.lax.rsqrt(var + eps) * g_ref[...] + bt_ref[...]
        ).astype(o_ref.dtype)


def linear_add_layernorm(x2d, w, b, res2d, gamma, beta, eps=1e-5, tm=256, tk=512):
    """LayerNorm(res2d + x2d @ w + b); x2d: (M, K), w: (K, N), res2d: (M, N)."""
    M, K = x2d.shape
    N = w.shape[1]
    tm = _pick_tile(M, tm)
    tk = _pick_tile(K, tk)
    return pl.pallas_call(
        functools.partial(_linear_add_ln_kernel, eps=eps),
        out_shape=jax.ShapeDtypeStruct((M, N), jnp.float32),
        grid=(M // tm, K // tk),
        in_specs=[
            pl.BlockSpec((tm, tk), lambda i, k: (i, k)),
            pl.BlockSpec((tk, N), lambda i, k: (k, 0)),
            pl.BlockSpec((1, N), lambda i, k: (0, 0)),
            pl.BlockSpec((tm, N), lambda i, k: (i, 0)),
            pl.BlockSpec((1, N), lambda i, k: (0, 0)),
            pl.BlockSpec((1, N), lambda i, k: (0, 0)),
        ],
        out_specs=pl.BlockSpec((tm, N), lambda i, k: (i, 0)),
        scratch_shapes=[pltpu.VMEM((tm, N), jnp.float32)],
        compiler_params=pltpu.CompilerParams(
            dimension_semantics=("parallel", "arbitrary"),
            vmem_limit_bytes=_VMEM_LIMIT,
        ),
    )(x2d, w, b.reshape(1, N), res2d, gamma.reshape(1, N), beta.reshape(1, N))


def _attn_kernel(q_ref, k_ref, v_ref, m_ref, o_ref, *, scale):
    """All heads of one batch element in a single block; mask shared across heads."""
    q = q_ref[0].astype(jnp.bfloat16)          # (H, Tq, dh)
    k = k_ref[0].astype(jnp.bfloat16)          # (H, Tk, dh)
    v = v_ref[0].astype(jnp.bfloat16)          # (H, Tk, dh)
    s = jnp.einsum("hqd,hkd->hqk", q, k, preferred_element_type=jnp.float32) * scale
    s = s + m_ref[...]                          # (H,Tq,Tk) + (1,Tq,Tk) broadcast
    s = s - jnp.max(s, axis=-1, keepdims=True)
    p = jnp.exp(s)
    p = p * pl.reciprocal(jnp.sum(p, axis=-1, keepdims=True), approx=True)
    o = jnp.einsum("hqk,hkd->hqd", p.astype(jnp.bfloat16), v,
                   preferred_element_type=jnp.float32)
    o_ref[0] = o.astype(o_ref.dtype)


def attention(q, k, v, mask, scale):
    """q/k/v: (B, H, T, dh); mask additive: (B, Tq, Tk) shared across heads."""
    B, H, Tq, dh = q.shape
    Tk = k.shape[2]
    return pl.pallas_call(
        functools.partial(_attn_kernel, scale=scale),
        out_shape=jax.ShapeDtypeStruct((B, H, Tq, dh), jnp.float32),
        grid=(B,),
        in_specs=[
            pl.BlockSpec((1, H, Tq, dh), lambda b: (b, 0, 0, 0)),
            pl.BlockSpec((1, H, Tk, dh), lambda b: (b, 0, 0, 0)),
            pl.BlockSpec((1, H, Tk, dh), lambda b: (b, 0, 0, 0)),
            pl.BlockSpec((1, Tq, Tk), lambda b: (b, 0, 0)),
        ],
        out_specs=pl.BlockSpec((1, H, Tq, dh), lambda b: (b, 0, 0, 0)),
        compiler_params=pltpu.CompilerParams(
            dimension_semantics=("parallel",),
            vmem_limit_bytes=_VMEM_LIMIT,
        ),
    )(q, k, v, mask)


# ----------------------------------------------------------------------------
# Model blocks (glue around the Pallas kernels)
# ----------------------------------------------------------------------------
def _split_heads(t2d, B, T, H, dh):
    return t2d.reshape(B, T, H, dh).transpose(0, 2, 1, 3)      # (B,H,T,dh)


def _merge_heads(t4d, B, T, D):
    return t4d.transpose(0, 2, 1, 3).reshape(B * T, D)


def decoder_layer(x, memory, p, tgt_mask, mem_mask, num_heads):
    """PyTorch post-norm TransformerDecoderLayer (norm_first=False, activation=relu)."""
    B, T, D = x.shape
    S = memory.shape[1]
    H = num_heads
    dh = D // H
    scale = 1.0 / math.sqrt(dh)

    # ---- self attention: fused QKV projection, fused (Wo + residual + LN1) ----
    sa_p = p["self_attn"]
    qkv = linear(x.reshape(B * T, D), sa_p["wqkv"], sa_p["bqkv"])        # (BT, 3D)
    qkv = qkv.reshape(B, T, 3, H, dh)
    q = qkv[:, :, 0].transpose(0, 2, 1, 3)
    k = qkv[:, :, 1].transpose(0, 2, 1, 3)
    v = qkv[:, :, 2].transpose(0, 2, 1, 3)
    sa = attention(q, k, v, tgt_mask, scale)                             # (B,H,T,dh)
    x2d = linear_add_layernorm(_merge_heads(sa, B, T, D),
                               sa_p["wo"], sa_p["bo"],
                               x.reshape(B * T, D), p["ln1_g"], p["ln1_b"])
    x = x2d.reshape(B, T, D)

    # ---- cross attention: fused KV projection, fused (Wo + residual + LN2) ----
    ca_p = p["cross_attn"]
    q = linear(x.reshape(B * T, D), ca_p["wq"], ca_p["bq"])
    q = _split_heads(q, B, T, H, dh)
    kv = linear(memory.reshape(B * S, D), ca_p["wkv"], ca_p["bkv"])      # (BS, 2D)
    kv = kv.reshape(B, S, 2, H, dh)
    k = kv[:, :, 0].transpose(0, 2, 1, 3)
    v = kv[:, :, 1].transpose(0, 2, 1, 3)
    ca = attention(q, k, v, mem_mask, scale)
    x2d = linear_add_layernorm(_merge_heads(ca, B, T, D),
                               ca_p["wo"], ca_p["bo"],
                               x.reshape(B * T, D), p["ln2_g"], p["ln2_b"])
    x = x2d.reshape(B, T, D)

    # ---- FFN: bias+ReLU fused into matmul-1; matmul-2 fused with residual + LN3 ----
    h = linear(x.reshape(B * T, D), p["ffn_w1"], p["ffn_b1"], relu=True)
    x2d = linear_add_layernorm(h, p["ffn_w2"], p["ffn_b2"],
                               x.reshape(B * T, D), p["ln3_g"], p["ln3_b"])
    return x2d.reshape(B, T, D)


def positional_encoding_table(max_len, d):
    pos = np.arange(max_len, dtype=np.float32).reshape(-1, 1)
    div = np.power(10000.0, np.arange(0, d, 2, dtype=np.float32) / d)
    angles = pos / div
    P = np.zeros((max_len, d), dtype=np.float32)
    P[:, 0::2] = np.sin(angles)
    P[:, 1::2] = np.cos(angles)
    return jnp.asarray(P)


def transformer_decoder_forward(params, X_tokens, memory, valid_lens, enc_valid_lens,
                                num_heads):
    B, T = X_tokens.shape
    D = params["embedding"].shape[1]
    S = memory.shape[1]
    NEG = -1e9

    # Embedding * sqrt(D) + positional encoding (dropout = identity at eval).
    x = params["embedding"][X_tokens] * math.sqrt(D) + params["pos_enc"][None, :T, :]

    # Single (B, Tq, Tk) additive masks — NOT replicated per head (kernel broadcasts).
    causal = jnp.where(jnp.arange(T)[:, None] >= jnp.arange(T)[None, :], 0.0, NEG)   # (T,T)
    tgt_kpm = jnp.where(jnp.arange(T)[None, :] < valid_lens[:, None], 0.0, NEG)      # (B,T)
    tgt_mask = causal[None, :, :] + tgt_kpm[:, None, :]                               # (B,T,T)
    mem_kpm = jnp.where(jnp.arange(S)[None, :] < enc_valid_lens[:, None], 0.0, NEG)   # (B,S)
    mem_mask = jnp.broadcast_to(mem_kpm[:, None, :], (B, T, S))                       # (B,T,S)

    for lp in params["layers"]:
        x = decoder_layer(x, memory, lp, tgt_mask, mem_mask, num_heads)

    logits = linear(x.reshape(B * T, D), params["dense_w"], params["dense_b"])
    return logits.reshape(B, T, -1)


# ----------------------------------------------------------------------------
# Deterministic parameter construction
# ----------------------------------------------------------------------------
def init_params(key, vocab_size, num_hiddens, ffn_num_hiddens, num_heads, num_layers,
                max_len=64):
    D = num_hiddens

    def nrm(k, shape, scale=0.02):
        return scale * jax.random.normal(k, shape, dtype=jnp.float32)

    keys = jax.random.split(key, 2 + num_layers)
    params = {
        "embedding": nrm(keys[0], (vocab_size, D), 1.0),
        "pos_enc": positional_encoding_table(max_len, D),
        "dense_w": nrm(keys[1], (D, vocab_size)),
        "dense_b": jnp.zeros((vocab_size,), jnp.float32),
        "layers": [],
    }

    def self_attn_params(k):
        ks = jax.random.split(k, 4)
        return {
            "wqkv": jnp.concatenate([nrm(ks[0], (D, D)), nrm(ks[1], (D, D)),
                                     nrm(ks[2], (D, D))], axis=1),
            "bqkv": jnp.zeros((3 * D,), jnp.float32),
            "wo": nrm(ks[3], (D, D)), "bo": jnp.zeros((D,), jnp.float32),
        }

    def cross_attn_params(k):
        ks = jax.random.split(k, 4)
        return {
            "wq": nrm(ks[0], (D, D)), "bq": jnp.zeros((D,), jnp.float32),
            "wkv": jnp.concatenate([nrm(ks[1], (D, D)), nrm(ks[2], (D, D))], axis=1),
            "bkv": jnp.zeros((2 * D,), jnp.float32),
            "wo": nrm(ks[3], (D, D)), "bo": jnp.zeros((D,), jnp.float32),
        }

    for l in range(num_layers):
        ks = jax.random.split(keys[2 + l], 4)
        params["layers"].append({
            "self_attn": self_attn_params(ks[0]),
            "cross_attn": cross_attn_params(ks[1]),
            "ffn_w1": nrm(ks[2], (D, ffn_num_hiddens)),
            "ffn_b1": jnp.zeros((ffn_num_hiddens,), jnp.float32),
            "ffn_w2": nrm(ks[3], (ffn_num_hiddens, D)),
            "ffn_b2": jnp.zeros((D,), jnp.float32),
            "ln1_g": jnp.ones((D,), jnp.float32), "ln1_b": jnp.zeros((D,), jnp.float32),
            "ln2_g": jnp.ones((D,), jnp.float32), "ln2_b": jnp.zeros((D,), jnp.float32),
            "ln3_g": jnp.ones((D,), jnp.float32), "ln3_b": jnp.zeros((D,), jnp.float32),
        })
    return params


# ----------------------------------------------------------------------------
# Driver
# ----------------------------------------------------------------------------
if __name__ == "__main__":
    vocab_size = 64
    num_hiddens = 32
    num_heads = 4
    ffn_num_hiddens = 64
    num_layers = 2
    B, T, S = 2, 8, 8

    root = jax.random.PRNGKey(0)
    kp, kx, km = jax.random.split(root, 3)

    params = init_params(kp, vocab_size, num_hiddens, ffn_num_hiddens, num_heads, num_layers)

    X_tokens = jax.random.randint(kx, (B, T), 0, vocab_size, dtype=jnp.int32)
    memory = jax.random.normal(km, (B, S, num_hiddens), dtype=jnp.float32)  # enc_outputs
    valid_lens = jnp.array([8, 5], dtype=jnp.int32)        # tgt valid lengths
    enc_valid_lens = jnp.array([8, 6], dtype=jnp.int32)    # memory valid lengths

    fwd = jax.jit(functools.partial(transformer_decoder_forward, num_heads=num_heads))
    logits = fwd(params, X_tokens, memory, valid_lens, enc_valid_lens)
    logits = jax.block_until_ready(logits)

    assert logits.shape == (B, T, vocab_size)
    assert bool(jnp.all(jnp.isfinite(logits)))
    print("KERNEL_OK")
</pallas_src>

<mosaic_0001>
module attributes {stable_mosaic.version = 11 : i64} {
  func.func @_linear_kernel(%arg0: i32, %arg1: i32, %arg2: i32, %arg3: memref<16x32xf32, #tpu.memory_space<vmem>>, %arg4: memref<32x96xf32, #tpu.memory_space<vmem>>, %arg5: memref<1x96xf32, #tpu.memory_space<vmem>>, %arg6: memref<16x96xf32, #tpu.memory_space<vmem>>, %arg7: memref<16x96xf32, #tpu.memory_space<vmem>>) attributes {dimension_semantics = [#tpu.dimension_semantics<parallel>, #tpu.dimension_semantics<parallel>, #tpu.dimension_semantics<arbitrary>], iteration_bounds = array<i64: 1, 1, 1>, scalar_prefetch = 0 : i64, scratch_operands = 1 : i64, tpu.core_type = #tpu.core_type<tc>, window_params = [{transform_indices = @transform_0, window_bounds = array<i64: 16, 32>}, {transform_indices = @transform_1, window_bounds = array<i64: 32, 96>}, {transform_indices = @transform_2, window_bounds = array<i64: 1, 96>}, {transform_indices = @transform_3, window_bounds = array<i64: 16, 96>}]} {
    %c0_i32 = arith.constant 0 : i32
    %0 = arith.cmpi eq, %arg2, %c0_i32 : i32
    %1 = arith.extui %0 : i1 to i32
    %c0_i32_0 = arith.constant 0 : i32
    %2 = arith.cmpi ne, %1, %c0_i32_0 : i32
    scf.if %2 {
      %cst_10 = arith.constant 0.000000e+00 : f32
      %14 = vector.broadcast %cst_10 : f32 to vector<16x96xf32>
      %c0_11 = arith.constant 0 : index
      %c0_12 = arith.constant 0 : index
      %15 = vector.load %arg7[%c0_11, %c0_12] : memref<16x96xf32, #tpu.memory_space<vmem>>, vector<16x96xf32>
      tpu.vector_store %arg7[%c0_11, %c0_12], %14 {strides = array<i32>} : memref<16x96xf32, #tpu.memory_space<vmem>>, vector<16x96xf32>,
    } else {
    }
    %c0 = arith.constant 0 : index
    %c0_1 = arith.constant 0 : index
    %3 = vector.load %arg7[%c0, %c0_1] : memref<16x96xf32, #tpu.memory_space<vmem>>, vector<16x96xf32>
    %c0_2 = arith.constant 0 : index
    %c0_3 = arith.constant 0 : index
    %4 = vector.load %arg3[%c0_2, %c0_3] : memref<16x32xf32, #tpu.memory_space<vmem>>, vector<16x32xf32>
    %5 = arith.truncf %4 : vector<16x32xf32> to vector<16x32xbf16>
    %c0_4 = arith.constant 0 : index
    %c0_5 = arith.constant 0 : index
    %6 = vector.load %arg4[%c0_4, %c0_5] : memref<32x96xf32, #tpu.memory_space<vmem>>, vector<32x96xf32>
    %7 = arith.truncf %6 : vector<32x96xf32> to vector<32x96xbf16>
    %cst = arith.constant dense<0.000000e+00> : vector<16x96xf32>
    %8 = tpu.matmul %5, %7, %cst {dimension_numbers = #tpu.dot_dimension_numbers<[1], [0], [0], [1], [0, 0, 1, 1], [], []>} : vector<16x32xbf16>, vector<32x96xbf16>, vector<16x96xf32> -> vector<16x96xf32>
    %9 = arith.addf %3, %8 : vector<16x96xf32>
    %c0_6 = arith.constant 0 : index
    %c0_7 = arith.constant 0 : index
    %10 = vector.load %arg7[%c0_6, %c0_7] : memref<16x96xf32, #tpu.memory_space<vmem>>, vector<16x96xf32>
    tpu.vector_store %arg7[%c0_6, %c0_7], %9 {strides = array<i32>} : memref<16x96xf32, #tpu.memory_space<vmem>>, vector<16x96xf32>,
    %c0_i32_8 = arith.constant 0 : i32
    %11 = arith.cmpi eq, %arg2, %c0_i32_8 : i32
    %12 = arith.extui %11 : i1 to i32
    %c0_i32_9 = arith.constant 0 : i32
    %13 = arith.cmpi ne, %12, %c0_i32_9 : i32
    scf.if %13 {
      %c0_10 = arith.constant 0 : index
      %c0_11 = arith.constant 0 : index
      %14 = vector.load %arg7[%c0_10, %c0_11] : memref<16x96xf32, #tpu.memory_space<vmem>>, vector<16x96xf32>
      %c0_12 = arith.constant 0 : index
      %c0_13 = arith.constant 0 : index
      %15 = vector.load %arg5[%c0_12, %c0_13] : memref<1x96xf32, #tpu.memory_space<vmem>>, vector<1x96xf32>
      %16 = vector.broadcast %15 : vector<1x96xf32> to vector<16x96xf32>
      %17 = arith.addf %14, %16 : vector<16x96xf32>
      %c0_14 = arith.constant 0 : index
      %c0_15 = arith.constant 0 : index
      %18 = vector.load %arg6[%c0_14, %c0_15] : memref<16x96xf32, #tpu.memory_space<vmem>>, vector<16x96xf32>
      tpu.vector_store %arg6[%c0_14, %c0_15], %17 {strides = array<i32>} : memref<16x96xf32, #tpu.memory_space<vmem>>, vector<16x96xf32>,
    } else {
    }
    return
  }
  func.func @transform_0(%arg0: i32, %arg1: i32, %arg2: i32) -> (i32, i32) {
    %c0_i32 = arith.constant 0 : i32
    return %arg0, %arg2 : i32, i32
  }
  func.func @transform_1(%arg0: i32, %arg1: i32, %arg2: i32) -> (i32, i32) {
    %c0_i32 = arith.constant 0 : i32
    return %arg2, %arg1 : i32, i32
  }
  func.func @transform_2(%arg0: i32, %arg1: i32, %arg2: i32) -> (i32, i32) {
    %c0_i32 = arith.constant 0 : i32
    %c0_i32_0 = arith.constant 0 : i32
    return %c0_i32, %arg1 : i32, i32
  }
  func.func @transform_3(%arg0: i32, %arg1: i32, %arg2: i32) -> (i32, i32) {
    %c0_i32 = arith.constant 0 : i32
    return %arg0, %arg1 : i32, i32
  }
}

module attributes {stable_mosaic.version = 11 : i64} {
  func.func @_attn_kernel(%arg0: i32, %arg1: memref<1x4x8x8xf32, #tpu.memory_space<vmem>>, %arg2: memref<1x4x8x8xf32, #tpu.memory_space<vmem>>, %arg3: memref<1x4x8x8xf32, #tpu.memory_space<vmem>>, %arg4: memref<1x8x8xf32, #tpu.memory_space<vmem>>, %arg5: memref<1x4x8x8xf32, #tpu.memory_space<vmem>>) attributes {dimension_semantics = [#tpu.dimension_semantics<parallel>], iteration_bounds = array<i64: 2>, scalar_prefetch = 0 : i64, scratch_operands = 0 : i64, tpu.core_type = #tpu.core_type<tc>, window_params = [{transform_indices = @transform_0, window_bounds = array<i64: 1, 4, 8, 8>}, {transform_indices = @transform_1, window_bounds = array<i64: 1, 4, 8, 8>}, {transform_indices = @transform_2, window_bounds = array<i64: 1, 4, 8, 8>}, {transform_indices = @transform_3, window_bounds = array<i64: 1, 8, 8>}, {transform_indices = @transform_4, window_bounds = array<i64: 1, 4, 8, 8>}]} {
    %c0 = arith.constant 0 : index
    %c0_0 = arith.constant 0 : index
    %c0_1 = arith.constant 0 : index
    %c0_2 = arith.constant 0 : index
    %0 = vector.load %arg1[%c0, %c0_0, %c0_1, %c0_2] : memref<1x4x8x8xf32, #tpu.memory_space<vmem>>, vector<1x4x8x8xf32>
    %1 = vector.shape_cast %0 : vector<1x4x8x8xf32> to vector<4x8x8xf32>
    %2 = arith.truncf %1 : vector<4x8x8xf32> to vector<4x8x8xbf16>
    %c0_3 = arith.constant 0 : index
    %c0_4 = arith.constant 0 : index
    %c0_5 = arith.constant 0 : index
    %c0_6 = arith.constant 0 : index
    %3 = vector.load %arg2[%c0_3, %c0_4, %c0_5, %c0_6] : memref<1x4x8x8xf32, #tpu.memory_space<vmem>>, vector<1x4x8x8xf32>
    %4 = vector.shape_cast %3 : vector<1x4x8x8xf32> to vector<4x8x8xf32>
    %5 = arith.truncf %4 : vector<4x8x8xf32> to vector<4x8x8xbf16>
    %c0_7 = arith.constant 0 : index
    %c0_8 = arith.constant 0 : index
    %c0_9 = arith.constant 0 : index
    %c0_10 = arith.constant 0 : index
    %6 = vector.load %arg3[%c0_7, %c0_8, %c0_9, %c0_10] : memref<1x4x8x8xf32, #tpu.memory_space<vmem>>, vector<1x4x8x8xf32>
    %7 = vector.shape_cast %6 : vector<1x4x8x8xf32> to vector<4x8x8xf32>
    %8 = arith.truncf %7 : vector<4x8x8xf32> to vector<4x8x8xbf16>
    "tpu.trace_start"() <{level = 10 : i32, message = "hqd,hkd->hqk"}> : () -> ()
    %cst = arith.constant dense<0.000000e+00> : vector<4x8x8xf32>
    %9 = tpu.matmul %2, %5, %cst {dimension_numbers = #tpu.dot_dimension_numbers<[2], [2], [1], [1], [0, 0, 0, 1, 1, 1], [0], [0]>} : vector<4x8x8xbf16>, vector<4x8x8xbf16>, vector<4x8x8xf32> -> vector<4x8x8xf32>
    "tpu.trace_stop"() : () -> ()
    %cst_11 = arith.constant 0.353553385 : f32
    %10 = vector.broadcast %cst_11 : f32 to vector<4x8x8xf32>
    %11 = arith.mulf %9, %10 : vector<4x8x8xf32>
    %c0_12 = arith.constant 0 : index
    %c0_13 = arith.constant 0 : index
    %c0_14 = arith.constant 0 : index
    %12 = vector.load %arg4[%c0_12, %c0_13, %c0_14] : memref<1x8x8xf32, #tpu.memory_space<vmem>>, vector<1x8x8xf32>
    %13 = vector.shape_cast %12 : vector<1x8x8xf32> to vector<1x8x8xf32>
    %14 = vector.broadcast %13 : vector<1x8x8xf32> to vector<4x8x8xf32>
    %15 = arith.addf %11, %14 : vector<4x8x8xf32>
    %cst_15 = arith.constant dense<0xFF800000> : vector<4x8xf32>
    %16 = vector.multi_reduction <maximumf>, %15, %cst_15 [2] : vector<4x8x8xf32> to vector<4x8xf32>
    %17 = vector.shape_cast %16 : vector<4x8xf32> to vector<4x8x1xf32>
    %18 = vector.broadcast %17 : vector<4x8x1xf32> to vector<4x8x8xf32>
    %19 = arith.subf %15, %18 : vector<4x8x8xf32>
    %20 = math.exp %19 : vector<4x8x8xf32>
    %cst_16 = arith.constant dense<0.000000e+00> : vector<4x8xf32>
    %21 = vector.multi_reduction <add>, %20, %cst_16 [2] : vector<4x8x8xf32> to vector<4x8xf32>
    %22 = vector.shape_cast %21 : vector<4x8xf32> to vector<4x8x1xf32>
    %23 = tpu.reciprocal %22 {approx = true} : vector<4x8x1xf32> -> vector<4x8x1xf32>
    %24 = vector.broadcast %23 : vector<4x8x1xf32> to vector<4x8x8xf32>
    %25 = arith.mulf %20, %24 : vector<4x8x8xf32>
    %26 = arith.truncf %25 : vector<4x8x8xf32> to vector<4x8x8xbf16>
    "tpu.trace_start"() <{level = 10 : i32, message = "hqk,hkd->hqd"}> : () -> ()
    %cst_17 = arith.constant dense<0.000000e+00> : vector<4x8x8xf32>
    %27 = tpu.matmul %26, %8, %cst_17 {dimension_numbers = #tpu.dot_dimension_numbers<[2], [1], [1], [2], [0, 0, 0, 1, 1, 2], [0], [0]>} : vector<4x8x8xbf16>, vector<4x8x8xbf16>, vector<4x8x8xf32> -> vector<4x8x8xf32>
    "tpu.trace_stop"() : () -> ()
    %c0_18 = arith.constant 0 : index
    %c0_19 = arith.constant 0 : index
    %c0_20 = arith.constant 0 : index
    %c0_21 = arith.constant 0 : index
    %28 = vector.load %arg5[%c0_18, %c0_19, %c0_20, %c0_21] : memref<1x4x8x8xf32, #tpu.memory_space<vmem>>, vector<1x4x8x8xf32>
    %29 = vector.shape_cast %28 : vector<1x4x8x8xf32> to vector<4x8x8xf32>
    %30 = vector.shape_cast %27 : vector<4x8x8xf32> to vector<1x4x8x8xf32>
    tpu.vector_store %arg5[%c0_18, %c0_19, %c0_20, %c0_21], %30 {strides = array<i32>} : memref<1x4x8x8xf32, #tpu.memory_space<vmem>>, vector<1x4x8x8xf32>,
    return
  }
  func.func @transform_0(%arg0: i32) -> (i32, i32, i32, i32) {
    %c0_i32 = arith.constant 0 : i32
    %c0_i32_0 = arith.constant 0 : i32
    %c0_i32_1 = arith.constant 0 : i32
    %c0_i32_2 = arith.constant 0 : i32
    return %arg0, %c0_i32, %c0_i32_0, %c0_i32_1 : i32, i32, i32, i32
  }
  func.func @transform_1(%arg0: i32) -> (i32, i32, i32, i32) {
    %c0_i32 = arith.constant 0 : i32
    %c0_i32_0 = arith.constant 0 : i32
    %c0_i32_1 = arith.constant 0 : i32
    %c0_i32_2 = arith.constant 0 : i32
    return %arg0, %c0_i32, %c0_i32_0, %c0_i32_1 : i32, i32, i32, i32
  }
  func.func @transform_2(%arg0: i32) -> (i32, i32, i32, i32) {
    %c0_i32 = arith.constant 0 : i32
    %c0_i32_0 = arith.constant 0 : i32
    %c0_i32_1 = arith.constant 0 : i32
    %c0_i32_2 = arith.constant 0 : i32
    return %arg0, %c0_i32, %c0_i32_0, %c0_i32_1 : i32, i32, i32, i32
  }
  func.func @transform_3(%arg0: i32) -> (i32, i32, i32) {
    %c0_i32 = arith.constant 0 : i32
    %c0_i32_0 = arith.constant 0 : i32
    %c0_i32_1 = arith.constant 0 : i32
    return %arg0, %c0_i32, %c0_i32_0 : i32, i32, i32
  }
  func.func @transform_4(%arg0: i32) -> (i32, i32, i32, i32) {
    %c0_i32 = arith.constant 0 : i32
    %c0_i32_0 = arith.constant 0 : i32
    %c0_i32_1 = arith.constant 0 : i32
    %c0_i32_2 = arith.constant 0 : i32
    return %arg0, %c0_i32, %c0_i32_0, %c0_i32_1 : i32, i32, i32, i32
  }
}

module attributes {stable_mosaic.version = 11 : i64} {
  func.func @_linear_add_ln_kernel(%arg0: i32, %arg1: i32, %arg2: memref<16x32xf32, #tpu.memory_space<vmem>>, %arg3: memref<32x32xf32, #tpu.memory_space<vmem>>, %arg4: memref<1x32xf32, #tpu.memory_space<vmem>>, %arg5: memref<16x32xf32, #tpu.memory_space<vmem>>, %arg6: memref<1x32xf32, #tpu.memory_space<vmem>>, %arg7: memref<1x32xf32, #tpu.memory_space<vmem>>, %arg8: memref<16x32xf32, #tpu.memory_space<vmem>>, %arg9: memref<16x32xf32, #tpu.memory_space<vmem>>) attributes {dimension_semantics = [#tpu.dimension_semantics<parallel>, #tpu.dimension_semantics<arbitrary>], iteration_bounds = array<i64: 1, 1>, scalar_prefetch = 0 : i64, scratch_operands = 1 : i64, tpu.core_type = #tpu.core_type<tc>, window_params = [{transform_indices = @transform_0, window_bounds = array<i64: 16, 32>}, {transform_indices = @transform_1, window_bounds = array<i64: 32, 32>}, {pipeline_mode = #tpu.pipeline_mode<synchronous>, transform_indices = @transform_2, window_bounds = array<i64: 1, 32>}, {transform_indices = @transform_3, window_bounds = array<i64: 16, 32>}, {pipeline_mode = #tpu.pipeline_mode<synchronous>, transform_indices = @transform_4, window_bounds = array<i64: 1, 32>}, {pipeline_mode = #tpu.pipeline_mode<synchronous>, transform_indices = @transform_5, window_bounds = array<i64: 1, 32>}, {transform_indices = @transform_6, window_bounds = array<i64: 16, 32>}]} {
    %c0_i32 = arith.constant 0 : i32
    %0 = arith.cmpi eq, %arg1, %c0_i32 : i32
    %1 = arith.extui %0 : i1 to i32
    %c0_i32_0 = arith.constant 0 : i32
    %2 = arith.cmpi ne, %1, %c0_i32_0 : i32
    scf.if %2 {
      %cst_10 = arith.constant 0.000000e+00 : f32
      %14 = vector.broadcast %cst_10 : f32 to vector<16x32xf32>
      %c0_11 = arith.constant 0 : index
      %c0_12 = arith.constant 0 : index
      %15 = vector.load %arg9[%c0_11, %c0_12] : memref<16x32xf32, #tpu.memory_space<vmem>>, vector<16x32xf32>
      tpu.vector_store %arg9[%c0_11, %c0_12], %14 {strides = array<i32>} : memref<16x32xf32, #tpu.memory_space<vmem>>, vector<16x32xf32>,
    } else {
    }
    %c0 = arith.constant 0 : index
    %c0_1 = arith.constant 0 : index
    %3 = vector.load %arg9[%c0, %c0_1] : memref<16x32xf32, #tpu.memory_space<vmem>>, vector<16x32xf32>
    %c0_2 = arith.constant 0 : index
    %c0_3 = arith.constant 0 : index
    %4 = vector.load %arg2[%c0_2, %c0_3] : memref<16x32xf32, #tpu.memory_space<vmem>>, vector<16x32xf32>
    %5 = arith.truncf %4 : vector<16x32xf32> to vector<16x32xbf16>
    %c0_4 = arith.constant 0 : index
    %c0_5 = arith.constant 0 : index
    %6 = vector.load %arg3[%c0_4, %c0_5] : memref<32x32xf32, #tpu.memory_space<vmem>>, vector<32x32xf32>
    %7 = arith.truncf %6 : vector<32x32xf32> to vector<32x32xbf16>
    %cst = arith.constant dense<0.000000e+00> : vector<16x32xf32>
    %8 = tpu.matmul %5, %7, %cst {dimension_numbers = #tpu.dot_dimension_numbers<[1], [0], [0], [1], [0, 0, 1, 1], [], []>} : vector<16x32xbf16>, vector<32x32xbf16>, vector<16x32xf32> -> vector<16x32xf32>
    %9 = arith.addf %3, %8 : vector<16x32xf32>
    %c0_6 = arith.constant 0 : index
    %c0_7 = arith.constant 0 : index
    %10 = vector.load %arg9[%c0_6, %c0_7] : memref<16x32xf32, #tpu.memory_space<vmem>>, vector<16x32xf32>
    tpu.vector_store %arg9[%c0_6, %c0_7], %9 {strides = array<i32>} : memref<16x32xf32, #tpu.memory_space<vmem>>, vector<16x32xf32>,
    %c0_i32_8 = arith.constant 0 : i32
    %11 = arith.cmpi eq, %arg1, %c0_i32_8 : i32
    %12 = arith.extui %11 : i1 to i32
    %c0_i32_9 = arith.constant 0 : i32
    %13 = arith.cmpi ne, %12, %c0_i32_9 : i32
    scf.if %13 {
      %c0_10 = arith.constant 0 : index
      %c0_11 = arith.constant 0 : index
      %14 = vector.load %arg9[%c0_10, %c0_11] : memref<16x32xf32, #tpu.memory_space<vmem>>, vector<16x32xf32>
      %c0_12 = arith.constant 0 : index
      %c0_13 = arith.constant 0 : index
      %15 = vector.load %arg4[%c0_12, %c0_13] : memref<1x32xf32, #tpu.memory_space<vmem>>, vector<1x32xf32>
      %16 = vector.broadcast %15 : vector<1x32xf32> to vector<16x32xf32>
      %17 = arith.addf %14, %16 : vector<16x32xf32>
      %c0_14 = arith.constant 0 : index
      %c0_15 = arith.constant 0 : index
      %18 = vector.load %arg5[%c0_14, %c0_15] : memref<16x32xf32, #tpu.memory_space<vmem>>, vector<16x32xf32>
      %19 = arith.addf %17, %18 : vector<16x32xf32>
      %cst_16 = arith.constant dense<0.000000e+00> : vector<16xf32>
      %20 = vector.multi_reduction <add>, %19, %cst_16 [1] : vector<16x32xf32> to vector<16xf32>
      %21 = vector.shape_cast %20 : vector<16xf32> to vector<16x1xf32>
      %cst_17 = arith.constant 3.200000e+01 : f32
      %22 = vector.broadcast %cst_17 : f32 to vector<16x1xf32>
      %23 = arith.divf %21, %22 : vector<16x1xf32>
      %24 = vector.broadcast %23 : vector<16x1xf32> to vector<16x32xf32>
      %25 = arith.subf %19, %24 : vector<16x32xf32>
      %26 = arith.mulf %25, %25 : vector<16x32xf32>
      %cst_18 = arith.constant dense<0.000000e+00> : vector<16xf32>
      %27 = vector.multi_reduction <add>, %26, %cst_18 [1] : vector<16x32xf32> to vector<16xf32>
      %28 = vector.shape_cast %27 : vector<16xf32> to vector<16x1xf32>
      %cst_19 = arith.constant 3.200000e+01 : f32
      %29 = vector.broadcast %cst_19 : f32 to vector<16x1xf32>
      %30 = arith.divf %28, %29 : vector<16x1xf32>
      %31 = vector.broadcast %23 : vector<16x1xf32> to vector<16x32xf32>
      %32 = arith.subf %19, %31 : vector<16x32xf32>
      %cst_20 = arith.constant 9.99999974E-6 : f32
      %33 = vector.broadcast %cst_20 : f32 to vector<16x1xf32>
      %34 = arith.addf %30, %33 : vector<16x1xf32>
      %35 = math.rsqrt %34 : vector<16x1xf32>
      %36 = vector.broadcast %35 : vector<16x1xf32> to vector<16x32xf32>
      %37 = arith.mulf %32, %36 : vector<16x32xf32>
      %c0_21 = arith.constant 0 : index
      %c0_22 = arith.constant 0 : index
      %38 = vector.load %arg6[%c0_21, %c0_22] : memref<1x32xf32, #tpu.memory_space<vmem>>, vector<1x32xf32>
      %39 = vector.broadcast %38 : vector<1x32xf32> to vector<16x32xf32>
      %40 = arith.mulf %37, %39 : vector<16x32xf32>
      %c0_23 = arith.constant 0 : index
      %c0_24 = arith.constant 0 : index
      %41 = vector.load %arg7[%c0_23, %c0_24] : memref<1x32xf32, #tpu.memory_space<vmem>>, vector<1x32xf32>
      %42 = vector.broadcast %41 : vector<1x32xf32> to vector<16x32xf32>
      %43 = arith.addf %40, %42 : vector<16x32xf32>
      %c0_25 = arith.constant 0 : index
      %c0_26 = arith.constant 0 : index
      %44 = vector.load %arg8[%c0_25, %c0_26] : memref<16x32xf32, #tpu.memory_space<vmem>>, vector<16x32xf32>
      tpu.vector_store %arg8[%c0_25, %c0_26], %43 {strides = array<i32>} : memref<16x32xf32, #tpu.memory_space<vmem>>, vector<16x32xf32>,
    } else {
    }
    return
  }
  func.func @transform_0(%arg0: i32, %arg1: i32) -> (i32, i32) {
    %c0_i32 = arith.constant 0 : i32
    return %arg0, %arg1 : i32, i32
  }
  func.func @transform_1(%arg0: i32, %arg1: i32) -> (i32, i32) {
    %c0_i32 = arith.constant 0 : i32
    %c0_i32_0 = arith.constant 0 : i32
    return %arg1, %c0_i32 : i32, i32
  }
  func.func @transform_2(%arg0: i32, %arg1: i32) -> (i32, i32) {
    %c0_i32 = arith.constant 0 : i32
    %c0_i32_0 = arith.constant 0 : i32
    %c0_i32_1 = arith.constant 0 : i32
    return %c0_i32, %c0_i32_0 : i32, i32
  }
  func.func @transform_3(%arg0: i32, %arg1: i32) -> (i32, i32) {
    %c0_i32 = arith.constant 0 : i32
    %c0_i32_0 = arith.constant 0 : i32
    return %arg0, %c0_i32 : i32, i32
  }
  func.func @transform_4(%arg0: i32, %arg1: i32) -> (i32, i32) {
    %c0_i32 = arith.constant 0 : i32
    %c0_i32_0 = arith.constant 0 : i32
    %c0_i32_1 = arith.constant 0 : i32
    return %c0_i32, %c0_i32_0 : i32, i32
  }
  func.func @transform_5(%arg0: i32, %arg1: i32) -> (i32, i32) {
    %c0_i32 = arith.constant 0 : i32
    %c0_i32_0 = arith.constant 0 : i32
    %c0_i32_1 = arith.constant 0 : i32
    return %c0_i32, %c0_i32_0 : i32, i32
  }
  func.func @transform_6(%arg0: i32, %arg1: i32) -> (i32, i32) {
    %c0_i32 = arith.constant 0 : i32
    %c0_i32_0 = arith.constant 0 : i32
    return %arg0, %c0_i32 : i32, i32
  }
}

module attributes {stable_mosaic.version = 11 : i64} {
  func.func @_linear_kernel(%arg0: i32, %arg1: i32, %arg2: i32, %arg3: memref<16x32xf32, #tpu.memory_space<vmem>>, %arg4: memref<32x32xf32, #tpu.memory_space<vmem>>, %arg5: memref<1x32xf32, #tpu.memory_space<vmem>>, %arg6: memref<16x32xf32, #tpu.memory_space<vmem>>, %arg7: memref<16x32xf32, #tpu.memory_space<vmem>>) attributes {dimension_semantics = [#tpu.dimension_semantics<parallel>, #tpu.dimension_semantics<parallel>, #tpu.dimension_semantics<arbitrary>], iteration_bounds = array<i64: 1, 1, 1>, scalar_prefetch = 0 : i64, scratch_operands = 1 : i64, tpu.core_type = #tpu.core_type<tc>, window_params = [{transform_indices = @transform_0, window_bounds = array<i64: 16, 32>}, {transform_indices = @transform_1, window_bounds = array<i64: 32, 32>}, {transform_indices = @transform_2, window_bounds = array<i64: 1, 32>}, {transform_indices = @transform_3, window_bounds = array<i64: 16, 32>}]} {
    %c0_i32 = arith.constant 0 : i32
    %0 = arith.cmpi eq, %arg2, %c0_i32 : i32
    %1 = arith.extui %0 : i1 to i32
    %c0_i32_0 = arith.constant 0 : i32
    %2 = arith.cmpi ne, %1, %c0_i32_0 : i32
    scf.if %2 {
      %cst_10 = arith.constant 0.000000e+00 : f32
      %14 = vector.broadcast %cst_10 : f32 to vector<16x32xf32>
      %c0_11 = arith.constant 0 : index
      %c0_12 = arith.constant 0 : index
      %15 = vector.load %arg7[%c0_11, %c0_12] : memref<16x32xf32, #tpu.memory_space<vmem>>, vector<16x32xf32>
      tpu.vector_store %arg7[%c0_11, %c0_12], %14 {strides = array<i32>} : memref<16x32xf32, #tpu.memory_space<vmem>>, vector<16x32xf32>,
    } else {
    }
    %c0 = arith.constant 0 : index
    %c0_1 = arith.constant 0 : index
    %3 = vector.load %arg7[%c0, %c0_1] : memref<16x32xf32, #tpu.memory_space<vmem>>, vector<16x32xf32>
    %c0_2 = arith.constant 0 : index
    %c0_3 = arith.constant 0 : index
    %4 = vector.load %arg3[%c0_2, %c0_3] : memref<16x32xf32, #tpu.memory_space<vmem>>, vector<16x32xf32>
    %5 = arith.truncf %4 : vector<16x32xf32> to vector<16x32xbf16>
    %c0_4 = arith.constant 0 : index
    %c0_5 = arith.constant 0 : index
    %6 = vector.load %arg4[%c0_4, %c0_5] : memref<32x32xf32, #tpu.memory_space<vmem>>, vector<32x32xf32>
    %7 = arith.truncf %6 : vector<32x32xf32> to vector<32x32xbf16>
    %cst = arith.constant dense<0.000000e+00> : vector<16x32xf32>
    %8 = tpu.matmul %5, %7, %cst {dimension_numbers = #tpu.dot_dimension_numbers<[1], [0], [0], [1], [0, 0, 1, 1], [], []>} : vector<16x32xbf16>, vector<32x32xbf16>, vector<16x32xf32> -> vector<16x32xf32>
    %9 = arith.addf %3, %8 : vector<16x32xf32>
    %c0_6 = arith.constant 0 : index
    %c0_7 = arith.constant 0 : index
    %10 = vector.load %arg7[%c0_6, %c0_7] : memref<16x32xf32, #tpu.memory_space<vmem>>, vector<16x32xf32>
    tpu.vector_store %arg7[%c0_6, %c0_7], %9 {strides = array<i32>} : memref<16x32xf32, #tpu.memory_space<vmem>>, vector<16x32xf32>,
    %c0_i32_8 = arith.constant 0 : i32
    %11 = arith.cmpi eq, %arg2, %c0_i32_8 : i32
    %12 = arith.extui %11 : i1 to i32
    %c0_i32_9 = arith.constant 0 : i32
    %13 = arith.cmpi ne, %12, %c0_i32_9 : i32
    scf.if %13 {
      %c0_10 = arith.constant 0 : index
      %c0_11 = arith.constant 0 : index
      %14 = vector.load %arg7[%c0_10, %c0_11] : memref<16x32xf32, #tpu.memory_space<vmem>>, vector<16x32xf32>
      %c0_12 = arith.constant 0 : index
      %c0_13 = arith.constant 0 : index
      %15 = vector.load %arg5[%c0_12, %c0_13] : memref<1x32xf32, #tpu.memory_space<vmem>>, vector<1x32xf32>
      %16 = vector.broadcast %15 : vector<1x32xf32> to vector<16x32xf32>
      %17 = arith.addf %14, %16 : vector<16x32xf32>
      %c0_14 = arith.constant 0 : index
      %c0_15 = arith.constant 0 : index
      %18 = vector.load %arg6[%c0_14, %c0_15] : memref<16x32xf32, #tpu.memory_space<vmem>>, vector<16x32xf32>
      tpu.vector_store %arg6[%c0_14, %c0_15], %17 {strides = array<i32>} : memref<16x32xf32, #tpu.memory_space<vmem>>, vector<16x32xf32>,
    } else {
    }
    return
  }
  func.func @transform_0(%arg0: i32, %arg1: i32, %arg2: i32) -> (i32, i32) {
    %c0_i32 = arith.constant 0 : i32
    return %arg0, %arg2 : i32, i32
  }
  func.func @transform_1(%arg0: i32, %arg1: i32, %arg2: i32) -> (i32, i32) {
    %c0_i32 = arith.constant 0 : i32
    return %arg2, %arg1 : i32, i32
  }
  func.func @transform_2(%arg0: i32, %arg1: i32, %arg2: i32) -> (i32, i32) {
    %c0_i32 = arith.constant 0 : i32
    %c0_i32_0 = arith.constant 0 : i32
    return %c0_i32, %arg1 : i32, i32
  }
  func.func @transform_3(%arg0: i32, %arg1: i32, %arg2: i32) -> (i32, i32) {
    %c0_i32 = arith.constant 0 : i32
    return %arg0, %arg1 : i32, i32
  }
}

module attributes {stable_mosaic.version = 11 : i64} {
  func.func @_linear_kernel(%arg0: i32, %arg1: i32, %arg2: i32, %arg3: memref<16x32xf32, #tpu.memory_space<vmem>>, %arg4: memref<32x64xf32, #tpu.memory_space<vmem>>, %arg5: memref<1x64xf32, #tpu.memory_space<vmem>>, %arg6: memref<16x64xf32, #tpu.memory_space<vmem>>, %arg7: memref<16x64xf32, #tpu.memory_space<vmem>>) attributes {dimension_semantics = [#tpu.dimension_semantics<parallel>, #tpu.dimension_semantics<parallel>, #tpu.dimension_semantics<arbitrary>], iteration_bounds = array<i64: 1, 1, 1>, scalar_prefetch = 0 : i64, scratch_operands = 1 : i64, tpu.core_type = #tpu.core_type<tc>, window_params = [{transform_indices = @transform_0, window_bounds = array<i64: 16, 32>}, {transform_indices = @transform_1, window_bounds = array<i64: 32, 64>}, {transform_indices = @transform_2, window_bounds = array<i64: 1, 64>}, {transform_indices = @transform_3, window_bounds = array<i64: 16, 64>}]} {
    %c0_i32 = arith.constant 0 : i32
    %0 = arith.cmpi eq, %arg2, %c0_i32 : i32
    %1 = arith.extui %0 : i1 to i32
    %c0_i32_0 = arith.constant 0 : i32
    %2 = arith.cmpi ne, %1, %c0_i32_0 : i32
    scf.if %2 {
      %cst_10 = arith.constant 0.000000e+00 : f32
      %14 = vector.broadcast %cst_10 : f32 to vector<16x64xf32>
      %c0_11 = arith.constant 0 : index
      %c0_12 = arith.constant 0 : index
      %15 = vector.load %arg7[%c0_11, %c0_12] : memref<16x64xf32, #tpu.memory_space<vmem>>, vector<16x64xf32>
      tpu.vector_store %arg7[%c0_11, %c0_12], %14 {strides = array<i32>} : memref<16x64xf32, #tpu.memory_space<vmem>>, vector<16x64xf32>,
    } else {
    }
    %c0 = arith.constant 0 : index
    %c0_1 = arith.constant 0 : index
    %3 = vector.load %arg7[%c0, %c0_1] : memref<16x64xf32, #tpu.memory_space<vmem>>, vector<16x64xf32>
    %c0_2 = arith.constant 0 : index
    %c0_3 = arith.constant 0 : index
    %4 = vector.load %arg3[%c0_2, %c0_3] : memref<16x32xf32, #tpu.memory_space<vmem>>, vector<16x32xf32>
    %5 = arith.truncf %4 : vector<16x32xf32> to vector<16x32xbf16>
    %c0_4 = arith.constant 0 : index
    %c0_5 = arith.constant 0 : index
    %6 = vector.load %arg4[%c0_4, %c0_5] : memref<32x64xf32, #tpu.memory_space<vmem>>, vector<32x64xf32>
    %7 = arith.truncf %6 : vector<32x64xf32> to vector<32x64xbf16>
    %cst = arith.constant dense<0.000000e+00> : vector<16x64xf32>
    %8 = tpu.matmul %5, %7, %cst {dimension_numbers = #tpu.dot_dimension_numbers<[1], [0], [0], [1], [0, 0, 1, 1], [], []>} : vector<16x32xbf16>, vector<32x64xbf16>, vector<16x64xf32> -> vector<16x64xf32>
    %9 = arith.addf %3, %8 : vector<16x64xf32>
    %c0_6 = arith.constant 0 : index
    %c0_7 = arith.constant 0 : index
    %10 = vector.load %arg7[%c0_6, %c0_7] : memref<16x64xf32, #tpu.memory_space<vmem>>, vector<16x64xf32>
    tpu.vector_store %arg7[%c0_6, %c0_7], %9 {strides = array<i32>} : memref<16x64xf32, #tpu.memory_space<vmem>>, vector<16x64xf32>,
    %c0_i32_8 = arith.constant 0 : i32
    %11 = arith.cmpi eq, %arg2, %c0_i32_8 : i32
    %12 = arith.extui %11 : i1 to i32
    %c0_i32_9 = arith.constant 0 : i32
    %13 = arith.cmpi ne, %12, %c0_i32_9 : i32
    scf.if %13 {
      %c0_10 = arith.constant 0 : index
      %c0_11 = arith.constant 0 : index
      %14 = vector.load %arg7[%c0_10, %c0_11] : memref<16x64xf32, #tpu.memory_space<vmem>>, vector<16x64xf32>
      %c0_12 = arith.constant 0 : index
      %c0_13 = arith.constant 0 : index
      %15 = vector.load %arg5[%c0_12, %c0_13] : memref<1x64xf32, #tpu.memory_space<vmem>>, vector<1x64xf32>
      %16 = vector.broadcast %15 : vector<1x64xf32> to vector<16x64xf32>
      %17 = arith.addf %14, %16 : vector<16x64xf32>
      %c0_14 = arith.constant 0 : index
      %c0_15 = arith.constant 0 : index
      %18 = vector.load %arg6[%c0_14, %c0_15] : memref<16x64xf32, #tpu.memory_space<vmem>>, vector<16x64xf32>
      tpu.vector_store %arg6[%c0_14, %c0_15], %17 {strides = array<i32>} : memref<16x64xf32, #tpu.memory_space<vmem>>, vector<16x64xf32>,
    } else {
    }
    return
  }
  func.func @transform_0(%arg0: i32, %arg1: i32, %arg2: i32) -> (i32, i32) {
    %c0_i32 = arith.constant 0 : i32
    return %arg0, %arg2 : i32, i32
  }
  func.func @transform_1(%arg0: i32, %arg1: i32, %arg2: i32) -> (i32, i32) {
    %c0_i32 = arith.constant 0 : i32
    return %arg2, %arg1 : i32, i32
  }
  func.func @transform_2(%arg0: i32, %arg1: i32, %arg2: i32) -> (i32, i32) {
    %c0_i32 = arith.constant 0 : i32
    %c0_i32_0 = arith.constant 0 : i32
    return %c0_i32, %arg1 : i32, i32
  }
  func.func @transform_3(%arg0: i32, %arg1: i32, %arg2: i32) -> (i32, i32) {
    %c0_i32 = arith.constant 0 : i32
    return %arg0, %arg1 : i32, i32
  }
}

module attributes {stable_mosaic.version = 11 : i64} {
  func.func @_linear_kernel(%arg0: i32, %arg1: i32, %arg2: i32, %arg3: memref<16x32xf32, #tpu.memory_space<vmem>>, %arg4: memref<32x64xf32, #tpu.memory_space<vmem>>, %arg5: memref<1x64xf32, #tpu.memory_space<vmem>>, %arg6: memref<16x64xf32, #tpu.memory_space<vmem>>, %arg7: memref<16x64xf32, #tpu.memory_space<vmem>>) attributes {dimension_semantics = [#tpu.dimension_semantics<parallel>, #tpu.dimension_semantics<parallel>, #tpu.dimension_semantics<arbitrary>], iteration_bounds = array<i64: 1, 1, 1>, scalar_prefetch = 0 : i64, scratch_operands = 1 : i64, tpu.core_type = #tpu.core_type<tc>, window_params = [{transform_indices = @transform_0, window_bounds = array<i64: 16, 32>}, {transform_indices = @transform_1, window_bounds = array<i64: 32, 64>}, {transform_indices = @transform_2, window_bounds = array<i64: 1, 64>}, {transform_indices = @transform_3, window_bounds = array<i64: 16, 64>}]} {
    %c0_i32 = arith.constant 0 : i32
    %0 = arith.cmpi eq, %arg2, %c0_i32 : i32
    %1 = arith.extui %0 : i1 to i32
    %c0_i32_0 = arith.constant 0 : i32
    %2 = arith.cmpi ne, %1, %c0_i32_0 : i32
    scf.if %2 {
      %cst_10 = arith.constant 0.000000e+00 : f32
      %14 = vector.broadcast %cst_10 : f32 to vector<16x64xf32>
      %c0_11 = arith.constant 0 : index
      %c0_12 = arith.constant 0 : index
      %15 = vector.load %arg7[%c0_11, %c0_12] : memref<16x64xf32, #tpu.memory_space<vmem>>, vector<16x64xf32>
      tpu.vector_store %arg7[%c0_11, %c0_12], %14 {strides = array<i32>} : memref<16x64xf32, #tpu.memory_space<vmem>>, vector<16x64xf32>,
    } else {
    }
    %c0 = arith.constant 0 : index
    %c0_1 = arith.constant 0 : index
    %3 = vector.load %arg7[%c0, %c0_1] : memref<16x64xf32, #tpu.memory_space<vmem>>, vector<16x64xf32>
    %c0_2 = arith.constant 0 : index
    %c0_3 = arith.constant 0 : index
    %4 = vector.load %arg3[%c0_2, %c0_3] : memref<16x32xf32, #tpu.memory_space<vmem>>, vector<16x32xf32>
    %5 = arith.truncf %4 : vector<16x32xf32> to vector<16x32xbf16>
    %c0_4 = arith.constant 0 : index
    %c0_5 = arith.constant 0 : index
    %6 = vector.load %arg4[%c0_4, %c0_5] : memref<32x64xf32, #tpu.memory_space<vmem>>, vector<32x64xf32>
    %7 = arith.truncf %6 : vector<32x64xf32> to vector<32x64xbf16>
    %cst = arith.constant dense<0.000000e+00> : vector<16x64xf32>
    %8 = tpu.matmul %5, %7, %cst {dimension_numbers = #tpu.dot_dimension_numbers<[1], [0], [0], [1], [0, 0, 1, 1], [], []>} : vector<16x32xbf16>, vector<32x64xbf16>, vector<16x64xf32> -> vector<16x64xf32>
    %9 = arith.addf %3, %8 : vector<16x64xf32>
    %c0_6 = arith.constant 0 : index
    %c0_7 = arith.constant 0 : index
    %10 = vector.load %arg7[%c0_6, %c0_7] : memref<16x64xf32, #tpu.memory_space<vmem>>, vector<16x64xf32>
    tpu.vector_store %arg7[%c0_6, %c0_7], %9 {strides = array<i32>} : memref<16x64xf32, #tpu.memory_space<vmem>>, vector<16x64xf32>,
    %c0_i32_8 = arith.constant 0 : i32
    %11 = arith.cmpi eq, %arg2, %c0_i32_8 : i32
    %12 = arith.extui %11 : i1 to i32
    %c0_i32_9 = arith.constant 0 : i32
    %13 = arith.cmpi ne, %12, %c0_i32_9 : i32
    scf.if %13 {
      %c0_10 = arith.constant 0 : index
      %c0_11 = arith.constant 0 : index
      %14 = vector.load %arg7[%c0_10, %c0_11] : memref<16x64xf32, #tpu.memory_space<vmem>>, vector<16x64xf32>
      %c0_12 = arith.constant 0 : index
      %c0_13 = arith.constant 0 : index
      %15 = vector.load %arg5[%c0_12, %c0_13] : memref<1x64xf32, #tpu.memory_space<vmem>>, vector<1x64xf32>
      %16 = vector.broadcast %15 : vector<1x64xf32> to vector<16x64xf32>
      %17 = arith.addf %14, %16 : vector<16x64xf32>
      %cst_14 = arith.constant 0.000000e+00 : f32
      %18 = vector.broadcast %cst_14 : f32 to vector<16x64xf32>
      %19 = arith.maximumf %17, %18 : vector<16x64xf32>
      %c0_15 = arith.constant 0 : index
      %c0_16 = arith.constant 0 : index
      %20 = vector.load %arg6[%c0_15, %c0_16] : memref<16x64xf32, #tpu.memory_space<vmem>>, vector<16x64xf32>
      tpu.vector_store %arg6[%c0_15, %c0_16], %19 {strides = array<i32>} : memref<16x64xf32, #tpu.memory_space<vmem>>, vector<16x64xf32>,
    } else {
    }
    return
  }
  func.func @transform_0(%arg0: i32, %arg1: i32, %arg2: i32) -> (i32, i32) {
    %c0_i32 = arith.constant 0 : i32
    return %arg0, %arg2 : i32, i32
  }
  func.func @transform_1(%arg0: i32, %arg1: i32, %arg2: i32) -> (i32, i32) {
    %c0_i32 = arith.constant 0 : i32
    return %arg2, %arg1 : i32, i32
  }
  func.func @transform_2(%arg0: i32, %arg1: i32, %arg2: i32) -> (i32, i32) {
    %c0_i32 = arith.constant 0 : i32
    %c0_i32_0 = arith.constant 0 : i32
    return %c0_i32, %arg1 : i32, i32
  }
  func.func @transform_3(%arg0: i32, %arg1: i32, %arg2: i32) -> (i32, i32) {
    %c0_i32 = arith.constant 0 : i32
    return %arg0, %arg1 : i32, i32
  }
}

module attributes {stable_mosaic.version = 11 : i64} {
  func.func @_linear_kernel(%arg0: i32, %arg1: i32, %arg2: i32, %arg3: memref<16x32xf32, #tpu.memory_space<vmem>>, %arg4: memref<32x64xf32, #tpu.memory_space<vmem>>, %arg5: memref<1x64xf32, #tpu.memory_space<vmem>>, %arg6: memref<16x64xf32, #tpu.memory_space<vmem>>, %arg7: memref<16x64xf32, #tpu.memory_space<vmem>>) attributes {dimension_semantics = [#tpu.dimension_semantics<parallel>, #tpu.dimension_semantics<parallel>, #tpu.dimension_semantics<arbitrary>], iteration_bounds = array<i64: 1, 1, 1>, scalar_prefetch = 0 : i64, scratch_operands = 1 : i64, tpu.core_type = #tpu.core_type<tc>, window_params = [{transform_indices = @transform_0, window_bounds = array<i64: 16, 32>}, {transform_indices = @transform_1, window_bounds = array<i64: 32, 64>}, {transform_indices = @transform_2, window_bounds = array<i64: 1, 64>}, {transform_indices = @transform_3, window_bounds = array<i64: 16, 64>}]} {
    %c0_i32 = arith.constant 0 : i32
    %0 = arith.cmpi eq, %arg2, %c0_i32 : i32
    %1 = arith.extui %0 : i1 to i32
    %c0_i32_0 = arith.constant 0 : i32
    %2 = arith.cmpi ne, %1, %c0_i32_0 : i32
    scf.if %2 {
      %cst_10 = arith.constant 0.000000e+00 : f32
      %14 = vector.broadcast %cst_10 : f32 to vector<16x64xf32>
      %c0_11 = arith.constant 0 : index
      %c0_12 = arith.constant 0 : index
      %15 = vector.load %arg7[%c0_11, %c0_12] : memref<16x64xf32, #tpu.memory_space<vmem>>, vector<16x64xf32>
      tpu.vector_store %arg7[%c0_11, %c0_12], %14 {strides = array<i32>} : memref<16x64xf32, #tpu.memory_space<vmem>>, vector<16x64xf32>,
    } else {
    }
    %c0 = arith.constant 0 : index
    %c0_1 = arith.constant 0 : index
    %3 = vector.load %arg7[%c0, %c0_1] : memref<16x64xf32, #tpu.memory_space<vmem>>, vector<16x64xf32>
    %c0_2 = arith.constant 0 : index
    %c0_3 = arith.constant 0 : index
    %4 = vector.load %arg3[%c0_2, %c0_3] : memref<16x32xf32, #tpu.memory_space<vmem>>, vector<16x32xf32>
    %5 = arith.truncf %4 : vector<16x32xf32> to vector<16x32xbf16>
    %c0_4 = arith.constant 0 : index
    %c0_5 = arith.constant 0 : index
    %6 = vector.load %arg4[%c0_4, %c0_5] : memref<32x64xf32, #tpu.memory_space<vmem>>, vector<32x64xf32>
    %7 = arith.truncf %6 : vector<32x64xf32> to vector<32x64xbf16>
    %cst = arith.constant dense<0.000000e+00> : vector<16x64xf32>
    %8 = tpu.matmul %5, %7, %cst {dimension_numbers = #tpu.dot_dimension_numbers<[1], [0], [0], [1], [0, 0, 1, 1], [], []>} : vector<16x32xbf16>, vector<32x64xbf16>, vector<16x64xf32> -> vector<16x64xf32>
    %9 = arith.addf %3, %8 : vector<16x64xf32>
    %c0_6 = arith.constant 0 : index
    %c0_7 = arith.constant 0 : index
    %10 = vector.load %arg7[%c0_6, %c0_7] : memref<16x64xf32, #tpu.memory_space<vmem>>, vector<16x64xf32>
    tpu.vector_store %arg7[%c0_6, %c0_7], %9 {strides = array<i32>} : memref<16x64xf32, #tpu.memory_space<vmem>>, vector<16x64xf32>,
    %c0_i32_8 = arith.constant 0 : i32
    %11 = arith.cmpi eq, %arg2, %c0_i32_8 : i32
    %12 = arith.extui %11 : i1 to i32
    %c0_i32_9 = arith.constant 0 : i32
    %13 = arith.cmpi ne, %12, %c0_i32_9 : i32
    scf.if %13 {
      %c0_10 = arith.constant 0 : index
      %c0_11 = arith.constant 0 : index
      %14 = vector.load %arg7[%c0_10, %c0_11] : memref<16x64xf32, #tpu.memory_space<vmem>>, vector<16x64xf32>
      %c0_12 = arith.constant 0 : index
      %c0_13 = arith.constant 0 : index
      %15 = vector.load %arg5[%c0_12, %c0_13] : memref<1x64xf32, #tpu.memory_space<vmem>>, vector<1x64xf32>
      %16 = vector.broadcast %15 : vector<1x64xf32> to vector<16x64xf32>
      %17 = arith.addf %14, %16 : vector<16x64xf32>
      %c0_14 = arith.constant 0 : index
      %c0_15 = arith.constant 0 : index
      %18 = vector.load %arg6[%c0_14, %c0_15] : memref<16x64xf32, #tpu.memory_space<vmem>>, vector<16x64xf32>
      tpu.vector_store %arg6[%c0_14, %c0_15], %17 {strides = array<i32>} : memref<16x64xf32, #tpu.memory_space<vmem>>, vector<16x64xf32>,
    } else {
    }
    return
  }
  func.func @transform_0(%arg0: i32, %arg1: i32, %arg2: i32) -> (i32, i32) {
    %c0_i32 = arith.constant 0 : i32
    return %arg0, %arg2 : i32, i32
  }
  func.func @transform_1(%arg0: i32, %arg1: i32, %arg2: i32) -> (i32, i32) {
    %c0_i32 = arith.constant 0 : i32
    return %arg2, %arg1 : i32, i32
  }
  func.func @transform_2(%arg0: i32, %arg1: i32, %arg2: i32) -> (i32, i32) {
    %c0_i32 = arith.constant 0 : i32
    %c0_i32_0 = arith.constant 0 : i32
    return %c0_i32, %arg1 : i32, i32
  }
  func.func @transform_3(%arg0: i32, %arg1: i32, %arg2: i32) -> (i32, i32) {
    %c0_i32 = arith.constant 0 : i32
    return %arg0, %arg1 : i32, i32
  }
}

module attributes {stable_mosaic.version = 11 : i64} {
  func.func @_linear_add_ln_kernel(%arg0: i32, %arg1: i32, %arg2: memref<16x64xf32, #tpu.memory_space<vmem>>, %arg3: memref<64x32xf32, #tpu.memory_space<vmem>>, %arg4: memref<1x32xf32, #tpu.memory_space<vmem>>, %arg5: memref<16x32xf32, #tpu.memory_space<vmem>>, %arg6: memref<1x32xf32, #tpu.memory_space<vmem>>, %arg7: memref<1x32xf32, #tpu.memory_space<vmem>>, %arg8: memref<16x32xf32, #tpu.memory_space<vmem>>, %arg9: memref<16x32xf32, #tpu.memory_space<vmem>>) attributes {dimension_semantics = [#tpu.dimension_semantics<parallel>, #tpu.dimension_semantics<arbitrary>], iteration_bounds = array<i64: 1, 1>, scalar_prefetch = 0 : i64, scratch_operands = 1 : i64, tpu.core_type = #tpu.core_type<tc>, window_params = [{transform_indices = @transform_0, window_bounds = array<i64: 16, 64>}, {transform_indices = @transform_1, window_bounds = array<i64: 64, 32>}, {pipeline_mode = #tpu.pipeline_mode<synchronous>, transform_indices = @transform_2, window_bounds = array<i64: 1, 32>}, {transform_indices = @transform_3, window_bounds = array<i64: 16, 32>}, {pipeline_mode = #tpu.pipeline_mode<synchronous>, transform_indices = @transform_4, window_bounds = array<i64: 1, 32>}, {pipeline_mode = #tpu.pipeline_mode<synchronous>, transform_indices = @transform_5, window_bounds = array<i64: 1, 32>}, {transform_indices = @transform_6, window_bounds = array<i64: 16, 32>}]} {
    %c0_i32 = arith.constant 0 : i32
    %0 = arith.cmpi eq, %arg1, %c0_i32 : i32
    %1 = arith.extui %0 : i1 to i32
    %c0_i32_0 = arith.constant 0 : i32
    %2 = arith.cmpi ne, %1, %c0_i32_0 : i32
    scf.if %2 {
      %cst_10 = arith.constant 0.000000e+00 : f32
      %14 = vector.broadcast %cst_10 : f32 to vector<16x32xf32>
      %c0_11 = arith.constant 0 : index
      %c0_12 = arith.constant 0 : index
      %15 = vector.load %arg9[%c0_11, %c0_12] : memref<16x32xf32, #tpu.memory_space<vmem>>, vector<16x32xf32>
      tpu.vector_store %arg9[%c0_11, %c0_12], %14 {strides = array<i32>} : memref<16x32xf32, #tpu.memory_space<vmem>>, vector<16x32xf32>,
    } else {
    }
    %c0 = arith.constant 0 : index
    %c0_1 = arith.constant 0 : index
    %3 = vector.load %arg9[%c0, %c0_1] : memref<16x32xf32, #tpu.memory_space<vmem>>, vector<16x32xf32>
    %c0_2 = arith.constant 0 : index
    %c0_3 = arith.constant 0 : index
    %4 = vector.load %arg2[%c0_2, %c0_3] : memref<16x64xf32, #tpu.memory_space<vmem>>, vector<16x64xf32>
    %5 = arith.truncf %4 : vector<16x64xf32> to vector<16x64xbf16>
    %c0_4 = arith.constant 0 : index
    %c0_5 = arith.constant 0 : index
    %6 = vector.load %arg3[%c0_4, %c0_5] : memref<64x32xf32, #tpu.memory_space<vmem>>, vector<64x32xf32>
    %7 = arith.truncf %6 : vector<64x32xf32> to vector<64x32xbf16>
    %cst = arith.constant dense<0.000000e+00> : vector<16x32xf32>
    %8 = tpu.matmul %5, %7, %cst {dimension_numbers = #tpu.dot_dimension_numbers<[1], [0], [0], [1], [0, 0, 1, 1], [], []>} : vector<16x64xbf16>, vector<64x32xbf16>, vector<16x32xf32> -> vector<16x32xf32>
    %9 = arith.addf %3, %8 : vector<16x32xf32>
    %c0_6 = arith.constant 0 : index
    %c0_7 = arith.constant 0 : index
    %10 = vector.load %arg9[%c0_6, %c0_7] : memref<16x32xf32, #tpu.memory_space<vmem>>, vector<16x32xf32>
    tpu.vector_store %arg9[%c0_6, %c0_7], %9 {strides = array<i32>} : memref<16x32xf32, #tpu.memory_space<vmem>>, vector<16x32xf32>,
    %c0_i32_8 = arith.constant 0 : i32
    %11 = arith.cmpi eq, %arg1, %c0_i32_8 : i32
    %12 = arith.extui %11 : i1 to i32
    %c0_i32_9 = arith.constant 0 : i32
    %13 = arith.cmpi ne, %12, %c0_i32_9 : i32
    scf.if %13 {
      %c0_10 = arith.constant 0 : index
      %c0_11 = arith.constant 0 : index
      %14 = vector.load %arg9[%c0_10, %c0_11] : memref<16x32xf32, #tpu.memory_space<vmem>>, vector<16x32xf32>
      %c0_12 = arith.constant 0 : index
      %c0_13 = arith.constant 0 : index
      %15 = vector.load %arg4[%c0_12, %c0_13] : memref<1x32xf32, #tpu.memory_space<vmem>>, vector<1x32xf32>
      %16 = vector.broadcast %15 : vector<1x32xf32> to vector<16x32xf32>
      %17 = arith.addf %14, %16 : vector<16x32xf32>
      %c0_14 = arith.constant 0 : index
      %c0_15 = arith.constant 0 : index
      %18 = vector.load %arg5[%c0_14, %c0_15] : memref<16x32xf32, #tpu.memory_space<vmem>>, vector<16x32xf32>
      %19 = arith.addf %17, %18 : vector<16x32xf32>
      %cst_16 = arith.constant dense<0.000000e+00> : vector<16xf32>
      %20 = vector.multi_reduction <add>, %19, %cst_16 [1] : vector<16x32xf32> to vector<16xf32>
      %21 = vector.shape_cast %20 : vector<16xf32> to vector<16x1xf32>
      %cst_17 = arith.constant 3.200000e+01 : f32
      %22 = vector.broadcast %cst_17 : f32 to vector<16x1xf32>
      %23 = arith.divf %21, %22 : vector<16x1xf32>
      %24 = vector.broadcast %23 : vector<16x1xf32> to vector<16x32xf32>
      %25 = arith.subf %19, %24 : vector<16x32xf32>
      %26 = arith.mulf %25, %25 : vector<16x32xf32>
      %cst_18 = arith.constant dense<0.000000e+00> : vector<16xf32>
      %27 = vector.multi_reduction <add>, %26, %cst_18 [1] : vector<16x32xf32> to vector<16xf32>
      %28 = vector.shape_cast %27 : vector<16xf32> to vector<16x1xf32>
      %cst_19 = arith.constant 3.200000e+01 : f32
      %29 = vector.broadcast %cst_19 : f32 to vector<16x1xf32>
      %30 = arith.divf %28, %29 : vector<16x1xf32>
      %31 = vector.broadcast %23 : vector<16x1xf32> to vector<16x32xf32>
      %32 = arith.subf %19, %31 : vector<16x32xf32>
      %cst_20 = arith.constant 9.99999974E-6 : f32
      %33 = vector.broadcast %cst_20 : f32 to vector<16x1xf32>
      %34 = arith.addf %30, %33 : vector<16x1xf32>
      %35 = math.rsqrt %34 : vector<16x1xf32>
      %36 = vector.broadcast %35 : vector<16x1xf32> to vector<16x32xf32>
      %37 = arith.mulf %32, %36 : vector<16x32xf32>
      %c0_21 = arith.constant 0 : index
      %c0_22 = arith.constant 0 : index
      %38 = vector.load %arg6[%c0_21, %c0_22] : memref<1x32xf32, #tpu.memory_space<vmem>>, vector<1x32xf32>
      %39 = vector.broadcast %38 : vector<1x32xf32> to vector<16x32xf32>
      %40 = arith.mulf %37, %39 : vector<16x32xf32>
      %c0_23 = arith.constant 0 : index
      %c0_24 = arith.constant 0 : index
      %41 = vector.load %arg7[%c0_23, %c0_24] : memref<1x32xf32, #tpu.memory_space<vmem>>, vector<1x32xf32>
      %42 = vector.broadcast %41 : vector<1x32xf32> to vector<16x32xf32>
      %43 = arith.addf %40, %42 : vector<16x32xf32>
      %c0_25 = arith.constant 0 : index
      %c0_26 = arith.constant 0 : index
      %44 = vector.load %arg8[%c0_25, %c0_26] : memref<16x32xf32, #tpu.memory_space<vmem>>, vector<16x32xf32>
      tpu.vector_store %arg8[%c0_25, %c0_26], %43 {strides = array<i32>} : memref<16x32xf32, #tpu.memory_space<vmem>>, vector<16x32xf32>,
    } else {
    }
    return
  }
  func.func @transform_0(%arg0: i32, %arg1: i32) -> (i32, i32) {
    %c0_i32 = arith.constant 0 : i32
    return %arg0, %arg1 : i32, i32
  }
  func.func @transform_1(%arg0: i32, %arg1: i32) -> (i32, i32) {
    %c0_i32 = arith.constant 0 : i32
    %c0_i32_0 = arith.constant 0 : i32
    return %arg1, %c0_i32 : i32, i32
  }
  func.func @transform_2(%arg0: i32, %arg1: i32) -> (i32, i32) {
    %c0_i32 = arith.constant 0 : i32
    %c0_i32_0 = arith.constant 0 : i32
    %c0_i32_1 = arith.constant 0 : i32
    return %c0_i32, %c0_i32_0 : i32, i32
  }
  func.func @transform_3(%arg0: i32, %arg1: i32) -> (i32, i32) {
    %c0_i32 = arith.constant 0 : i32
    %c0_i32_0 = arith.constant 0 : i32
    return %arg0, %c0_i32 : i32, i32
  }
  func.func @transform_4(%arg0: i32, %arg1: i32) -> (i32, i32) {
    %c0_i32 = arith.constant 0 : i32
    %c0_i32_0 = arith.constant 0 : i32
    %c0_i32_1 = arith.constant 0 : i32
    return %c0_i32, %c0_i32_0 : i32, i32
  }
  func.func @transform_5(%arg0: i32, %arg1: i32) -> (i32, i32) {
    %c0_i32 = arith.constant 0 : i32
    %c0_i32_0 = arith.constant 0 : i32
    %c0_i32_1 = arith.constant 0 : i32
    return %c0_i32, %c0_i32_0 : i32, i32
  }
  func.func @transform_6(%arg0: i32, %arg1: i32) -> (i32, i32) {
    %c0_i32 = arith.constant 0 : i32
    %c0_i32_0 = arith.constant 0 : i32
    return %arg0, %c0_i32 : i32, i32
  }
}

</mosaic_0001>

<bundles_post_ra>
// kernel: transformer_decoder_forward.19
= control target key start
LH: loop header
LB: loop body
LE: loop exit
PB: predicated region body
PF: predicated region fallthrough
CT: control target
= control target key end

     0   :  { %vm19_vm0 = vcmask 785408   ;;  %v76_v3 = vmov 0.0   ;;  %vm33_vm1 = vcmask 261120   ;;  %s130_s1 = inlined_call_operand.vmem [shape: f32[32,96], index: 1, kind: input, shape index: {}]   ;;  %s131_s0 = inlined_call_operand.vmem [shape: f32[16,32], index: 0, kind: input, shape index: {}]   ;;  %s132_s2 = inlined_call_operand.vmem [shape: f32[1,96], index: 2, kind: input, shape index: {}]   ;;  %s133_s3 = inlined_call_operand.vmem [shape: f32[16,96], index: 3, kind: output, shape index: {}]  }
   0x1   :  { %v29_v0 = vld [vmem:[%s130_s1 + $0x10] sm:$0xff]  ;;  %v30_v1 = vld [vmem:[%s130_s1 + $0x18] sm:$0xff]  ;;  %v27_v2 = vld [vmem:[%s130_s1] sm:$0xff]  ;;  %20 = vst.msk [vmem:[#allocation2] sm:$0xff] %vm19_vm0, %v76_v3 }
   0x2   :  { %v32_v4 = vpack.c.bf16 %v30_v1, %v29_v0  ;;  %v28_v5 = vld [vmem:[%s130_s1 + $0x8] sm:$0xff]  ;;  %21 = vst.msk [vmem:[#allocation2 + $0x8] sm:$0xff] %vm19_vm0, %v76_v3  ;;  %v24_v7 = vld [vmem:[%s131_s0] sm:$0xff] }
   0x3   :  { %v31_v6 = vpack.c.bf16 %v28_v5, %v27_v2  ;;  %v25_v8 = vld [vmem:[%s131_s0 + $0x8] sm:$0xff]  ;;  %v75_v14 = vld [vmem:[%s132_s2] ss:$0 sm:$0xff] }
   0x4   :  { %43 = vmatpush.bf16.msra.mxu0 %v32_v4  ;;  %v26_v9 = vpack.c.bf16 %v25_v8, %v24_v7 }
   0x8   :  { %44 = vmatpush.bf16.msra.mxu0 %v31_v6  ;;  %v22_v10 = vld [vmem:[#allocation2] sm:$0xff] }
   0x9   :  { %v23_v13 = vld [vmem:[#allocation2 + $0x8] sm:$0xff] }
   0xb   :  { %73 = vmatmul.msk.bf16.vlgmr.msra.gmra.mxu0 %vm33_vm1, %v26_v9 }
  0x88   :  { %v46_v11 = vpop.f32.mrf.mxu0 }
  0x89   :  { %v51_v12 = vadd.f32 %v46_v11, %v22_v10 }
  0x8b   :  { %54 = vst.msk [vmem:[#allocation2] sm:$0xff] %vm19_vm0, %v51_v12 }
  0x90   :  { %v48_v15 = vpop.f32.mrf.mxu0 }
  0x91   :  { %v52_v16 = vadd.f32 %v48_v15, %v23_v13 }
  0x92   :  { %v59_v17 = vld [vmem:[#allocation2] sm:$0xff] }
  0x93   :  { %v65_v18 = vadd.f32 %v75_v14, %v59_v17  ;;  %55 = vst.msk [vmem:[#allocation2 + $0x8] sm:$0xff] %vm19_vm0, %v52_v16 }
  0x95   :  { %67 = vst.msk [vmem:[%s133_s3] sm:$0xff] %vm19_vm0, %v65_v18 }
  0x9a   :  { %v60_v19 = vld [vmem:[#allocation2 + $0x8] sm:$0xff] }
  0x9b   :  { %v66_v20 = vadd.f32 %v75_v14, %v60_v19 }
  0x9d   :  { %68 = vst.msk [vmem:[%s133_s3 + $0x8] sm:$0xff] %vm19_vm0, %v66_v20 }

// kernel: transformer_decoder_forward.22
= control target key start
LH: loop header
LB: loop body
LE: loop exit
PB: predicated region body
PF: predicated region fallthrough
CT: control target
= control target key end

     0   :  { %vm19_vm0 = vcmask 261120   ;;  %v75_v3 = vmov 0.0   ;;  %s130_s1 = inlined_call_operand.vmem [shape: f32[32,32], index: 1, kind: input, shape index: {}]   ;;  %s131_s0 = inlined_call_operand.vmem [shape: f32[16,32], index: 0, kind: input, shape index: {}]   ;;  %s132_s2 = inlined_call_operand.vmem [shape: f32[1,32], index: 2, kind: input, shape index: {}]   ;;  %s133_s3 = inlined_call_operand.vmem [shape: f32[16,32], index: 3, kind: output, shape index: {}]  }
   0x1   :  { %v29_v0 = vld [vmem:[%s130_s1 + $0x10] sm:$0xff]  ;;  %v30_v1 = vld [vmem:[%s130_s1 + $0x18] sm:$0xff]  ;;  %v27_v2 = vld [vmem:[%s130_s1] sm:$0xff]  ;;  %20 = vst.msk [vmem:[#allocation2] sm:$0xff] %vm19_vm0, %v75_v3 }
   0x2   :  { %v32_v4 = vpack.c.bf16 %v30_v1, %v29_v0  ;;  %v28_v5 = vld [vmem:[%s130_s1 + $0x8] sm:$0xff]  ;;  %21 = vst.msk [vmem:[#allocation2 + $0x8] sm:$0xff] %vm19_vm0, %v75_v3  ;;  %v24_v7 = vld [vmem:[%s131_s0] sm:$0xff] }
   0x3   :  { %v31_v6 = vpack.c.bf16 %v28_v5, %v27_v2  ;;  %v25_v8 = vld [vmem:[%s131_s0 + $0x8] sm:$0xff]  ;;  %v74_v14 = vld [vmem:[%s132_s2] ss:$0 sm:$0xff] }
   0x4   :  { %43 = vmatpush.bf16.msra.mxu0 %v32_v4  ;;  %v26_v9 = vpack.c.bf16 %v25_v8, %v24_v7 }
   0x8   :  { %44 = vmatpush.bf16.msra.mxu0 %v31_v6  ;;  %v22_v10 = vld [vmem:[#allocation2] sm:$0xff] }
   0x9   :  { %v23_v13 = vld [vmem:[#allocation2 + $0x8] sm:$0xff] }
   0xb   :  { %72 = vmatmul.msk.bf16.vlgmr.msra.gmra.mxu0 %vm19_vm0, %v26_v9 }
  0x88   :  { %v46_v11 = vpop.f32.mrf.mxu0 }
  0x89   :  { %v51_v12 = vadd.f32 %v46_v11, %v22_v10 }
  0x8b   :  { %53 = vst.msk [vmem:[#allocation2] sm:$0xff] %vm19_vm0, %v51_v12 }
  0x90   :  { %v48_v15 = vpop.f32.mrf.mxu0 }
  0x91   :  { %v52_v16 = vadd.f32 %v48_v15, %v23_v13 }
  0x92   :  { %v58_v17 = vld [vmem:[#allocation2] sm:$0xff] }
  0x93   :  { %v64_v18 = vadd.f32 %v74_v14, %v58_v17  ;;  %54 = vst.msk [vmem:[#allocation2 + $0x8] sm:$0xff] %vm19_vm0, %v52_v16 }
  0x95   :  { %66 = vst.msk [vmem:[%s133_s3] sm:$0xff] %vm19_vm0, %v64_v18 }
  0x9a   :  { %v59_v19 = vld [vmem:[#allocation2 + $0x8] sm:$0xff] }
  0x9b   :  { %v65_v20 = vadd.f32 %v74_v14, %v59_v19 }
  0x9d   :  { %67 = vst.msk [vmem:[%s133_s3 + $0x8] sm:$0xff] %vm19_vm0, %v65_v20 }

// kernel: transformer_decoder_forward.20
= control target key start
LH: loop header
LB: loop body
LE: loop exit
PB: predicated region body
PF: predicated region fallthrough
CT: control target
= control target key end

     0   :  { %s671_s15 = smov 0   ;;  %s731_s0 = inlined_call_operand.vmem [shape: f32[2,4,8,8], index: 0, kind: input, shape index: {}]   ;;  %s732_s1 = inlined_call_operand.vmem [shape: f32[2,4,8,8], index: 1, kind: input, shape index: {}]   ;;  %s733_s2 = inlined_call_operand.vmem [shape: f32[2,4,8,8], index: 2, kind: input, shape index: {}]   ;;  %s734_s3 = inlined_call_operand.vmem [shape: f32[2,8,8], index: 3, kind: input, shape index: {}]   ;;  %s735_s4 = inlined_call_operand.vmem [shape: f32[2,4,8,8], index: 4, kind: output, shape index: {}]  }
   0x1 LB: > { %s586_s16 = sadd.s32 4294967295, %s644_s15   ;;  %p590_p0 = scmp.ge.s32.totalorder %s644_s15, 1  ;;  %s644_s15 = sphi %s671_s15, %s14_s15  }
   0x2   : > { %p191_p1 = scmp.lt.s32.totalorder %s644_s15, 3 }
   0x4   : > { %p192_p2 = pnand %p590_p0, %p191_p1 }
   0x5   : > { %p231_p3 = scmp.lt.s32.totalorder (!%p192_p2), %s586_s16, 1 }
   0x6   : > { %195 = sbr.rel (%p192_p2) target bundleno = 565 (0x235), region = 36 }
   0xb   : > { %s737_s16 = smov (!%p231_p3, %s586_s16), 1  ;;  %vm280_vm0 = vcmask 64512   ;;  %vm417_vm1 = vcmask 1043456  }
   0xc   : > { %s682_s17 = sshll.u32 %s737_s16, 5  ;;  %s597_s24 = sshll.u32 %s737_s16, 3 }
   0xd   : > { %s240_s20 = scalar_lea.vmem %s732_s1, %s682_s17  ;;  %s235_s23 = scalar_lea.vmem %s731_s0, %s682_s17 }
   0xe   : > { %v264_v0 = vld [vmem:[%s240_s20] sm:$0xff]  ;;  %v266_v1 = vld [vmem:[%s240_s20 + $0x10] sm:$0xff]  ;;  %v267_v2 = vld [vmem:[%s240_s20 + $0x18] sm:$0xff]  ;;  %s249_s27 = scalar_lea.vmem %s734_s3, %s597_s24  ;;  %s245_s30 = scalar_lea.vmem %s733_s2, %s682_s17 }
   0xf   : > { %v268_v3 = vpack.c.bf16 %v264_v0, %v264_v0  ;;  %v270_v4 = vpack.c.bf16 %v266_v1, %v266_v1  ;;  %v271_v5 = vpack.c.bf16 %v267_v2, %v267_v2  ;;  %v265_v6 = vld [vmem:[%s240_s20 + $0x8] sm:$0xff]  ;;  %v256_v11 = vld [vmem:[%s235_s23] sm:$0xff]  ;;  %v258_v12 = vld [vmem:[%s235_s23 + $0x10] sm:$0xff]  ;;  %s254_s7 = scalar_lea.vmem %s735_s4, %s682_s17 }
  0x10   : > { %v269_v10 = vpack.c.bf16 %v265_v6, %v265_v6  ;;  %v259_v13 = vld [vmem:[%s235_s23 + $0x18] sm:$0xff]  ;;  %v257_v15 = vld [vmem:[%s235_s23 + $0x8] sm:$0xff]  ;;  %v260_v16 = vpack.c.bf16 %v256_v11, %v256_v11  ;;  %v262_v17 = vpack.c.bf16 %v258_v12, %v258_v12  ;;  %v361_v21 = vld [vmem:[%s249_s27] sm:$0xff] }
  0x11   : > { %v285_v7 = vsel %vm280_vm0, %v268_v3, 0  ;;  %v323_v8 = vsel %vm280_vm0, %v270_v4, 0  ;;  %v342_v9 = vsel %vm280_vm0, %v271_v5, 0  ;;  %v263_v18 = vpack.c.bf16 %v259_v13, %v259_v13  ;;  %v272_v61 = vld [vmem:[%s245_s30] sm:$0xff]  ;;  %v274_v0 = vld [vmem:[%s245_s30 + $0x10] sm:$0xff]  ;;  %v273_v2 = vld [vmem:[%s245_s30 + $0x8] sm:$0xff] }
  0x12   : > { %294 = vmatpush.bf16.xpose.msra.mxu0 %v285_v7  ;;  %332 = vmatpush.bf16.xpose.msra.mxu2 %v323_v8  ;;  %v304_v14 = vsel %vm280_vm0, %v269_v10, 0  ;;  %v261_v19 = vpack.c.bf16 %v257_v15, %v257_v15  ;;  %v276_v62 = vpack.c.bf16 %v272_v61, %v272_v61  ;;  %v278_v1 = vpack.c.bf16 %v274_v0, %v274_v0  ;;  %v275_v6 = vld [vmem:[%s245_s30 + $0x18] sm:$0xff] }
  0x13   : > { %351 = vmatpush.bf16.xpose.msra.mxu3 %v342_v9  ;;  %313 = vmatpush.bf16.xpose.msra.mxu1 %v304_v14  ;;  %v277_v4 = vpack.c.bf16 %v273_v2, %v273_v2  ;;  %v279_v7 = vpack.c.bf16 %v275_v6, %v275_v6 }
  0x14   : > { %v419_v63 = vsel %vm417_vm1, %v276_v62, 0  ;;  %v457_v3 = vsel %vm417_vm1, %v278_v1, 0 }
  0x15   : > { %v438_v5 = vsel %vm417_vm1, %v277_v4, 0  ;;  %v476_v8 = vsel %vm417_vm1, %v279_v7, 0 }
  0x19   : > { %600 = vmatmul.msk.bf16.vlgmr.msra.gmra.mxu0 %vm280_vm0, %v260_v16  ;;  %602 = vmatmul.msk.bf16.vlgmr.msra.gmra.mxu2 %vm280_vm0, %v262_v17 }
  0x1a   : > { %603 = vmatmul.msk.bf16.vlgmr.msra.gmra.mxu3 %vm280_vm0, %v263_v18  ;;  %601 = vmatmul.msk.bf16.vlgmr.msra.gmra.mxu1 %vm280_vm0, %v261_v19 }
  0x1b   : > { %428 = vmatpush.bf16.msrb.mxu0 %v419_v63  ;;  %466 = vmatpush.bf16.msrb.mxu2 %v457_v3 }
  0x1c   : > { %447 = vmatpush.bf16.msrb.mxu1 %v438_v5  ;;  %485 = vmatpush.bf16.msrb.mxu3 %v476_v8 }
  0x96   : > { %v296_v20 = vpop.f32.mrf.mxu0 }
  0x97   : > { %v357_v22 = vmul.f32 0.35355338, %v296_v20  ;;  %v315_v23 = vpop.f32.mrf.mxu1 }
  0x98   : > { %v358_v25 = vmul.f32 0.35355338, %v315_v23 }
  0x99   : > { %v362_v24 = vadd.f32 %v361_v21, %v357_v22 }
  0x9a   : > { %v363_v30 = vadd.f32 %v361_v21, %v358_v25 }
  0x9b   : > { %v366_v26 = vsel %vm280_vm0, %v362_v24, -inf }
  0x9c   : > { %v334_v27 = vpop.f32.mrf.mxu2  ;;  %367 = vmax.xlane.f32.xlu1 %v366_v26  ;;  %v369_v36 = vsel %vm280_vm0, %v363_v30, -inf }
  0x9d   : > { %v359_v28 = vmul.f32 0.35355338, %v334_v27  ;;  %v353_v29 = vpop.f32.mrf.mxu3 }
  0x9e   : > { %v298_v31 = vpop.f32.mrf.mxu0  ;;  %v360_v32 = vmul.f32 0.35355338, %v353_v29 }
  0x9f   : > { %v364_v33 = vadd.f32 %v361_v21, %v359_v28  ;;  %v317_v34 = vpop.f32.mrf.mxu1 }
  0xa0   : > { %v365_v37 = vadd.f32 %v361_v21, %v360_v32 }
  0xa1   : > { %v372_v35 = vsel %vm280_vm0, %v364_v33, -inf }
  0xa2   : > { %373 = vmax.xlane.f32.xlu0 %v372_v35  ;;  %v375_v40 = vsel %vm280_vm0, %v365_v37, -inf }
  0xa4   : > { %v336_v38 = vpop.f32.mrf.mxu2  ;;  %370 = vmax.xlane.f32.xlu1 %v369_v36 }
  0xa5   : > { %v355_v39 = vpop.f32.mrf.mxu3 }
  0xaa   : > { %376 = vmax.xlane.f32.xlu0 %v375_v40 }
 0x10f   : > { %v368_v41 = vpop.xlane.xlu1 %367 }
 0x110   : > { %v378_v42 = vsub.f32 %v362_v24, %v368_v41 }
 0x112   : > { %v382_v43 = vmul.f32 1.442695, %v378_v42 }
 0x114   : > { %622 = vpow2.f32 %v382_v43 }
 0x115   : > { %v374_v44 = vpop.xlane.xlu0 %373 }
 0x116   : > { %v380_v45 = vsub.f32 %v364_v33, %v374_v44 }
 0x117   : > { %v371_v46 = vpop.xlane.xlu1 %370 }
 0x118   : > { %v386_v47 = vmul.f32 1.442695, %v380_v45  ;;  %v379_v48 = vsub.f32 %v363_v30, %v371_v46 }
 0x11a   : > { %v623_v49 = vpop.eup %622  ;;  %624 = vpow2.f32 %v386_v47  ;;  %v384_v50 = vmul.f32 1.442695, %v379_v48 }
 0x11b   : > { %v390_v51 = vsel %vm280_vm0, %v623_v49, 0.0 }
 0x11c   : > { %626 = vpow2.f32 %v384_v50  ;;  %391 = vadd.xlane.f32.xlu0 %v390_v51 }
 0x11d   : > { %v377_v52 = vpop.xlane.xlu0 %376 }
 0x11e   : > { %v381_v53 = vsub.f32 %v365_v37, %v377_v52 }
 0x120   : > { %v625_v54 = vpop.eup %624  ;;  %v388_v55 = vmul.f32 1.442695, %v381_v53 }
 0x121   : > { %v396_v56 = vsel %vm280_vm0, %v625_v54, 0.0 }
 0x122   : > { %v627_v57 = vpop.eup %626  ;;  %628 = vpow2.f32 %v388_v55  ;;  %397 = vadd.xlane.f32.xlu2 %v396_v56 }
 0x123   : > { %v393_v58 = vsel %vm280_vm0, %v627_v57, 0.0 }
 0x124   : > { %394 = vadd.xlane.f32.xlu1 %v393_v58 }
 0x128   : > { %v629_v59 = vpop.eup %628 }
 0x129   : > { %v399_v60 = vsel %vm280_vm0, %v629_v59, 0.0 }
 0x12a   : > { %400 = vadd.xlane.f32.xlu2 %v399_v60 }
 0x18f   : > { %v392_v9 = vpop.xlane.xlu0 %391 }
 0x190   : > { %630 = vrcp.f32 %v392_v9 }
 0x195   : > { %v398_v10 = vpop.xlane.xlu2 %397 }
 0x196   : > { %v631_v11 = vpop.eup %630  ;;  %632 = vrcp.f32 %v398_v10 }
 0x197   : > { %v406_v12 = vmul.f32 %v631_v11, %v623_v49  ;;  %v395_v13 = vpop.xlane.xlu1 %394 }
 0x198   : > { %634 = vrcp.f32 %v395_v13 }
 0x199   : > { %v410_v14 = vpack.c.bf16 %v406_v12, %v406_v12 }
 0x19b   : > { %604 = vmatmul.msk.bf16.vlgmr.msrb.gmra.mxu0 %vm280_vm0, %v410_v14 }
 0x19c   : > { %v633_v15 = vpop.eup %632 }
 0x19d   : > { %v408_v16 = vmul.f32 %v633_v15, %v625_v54  ;;  %v401_v17 = vpop.xlane.xlu2 %400 }
 0x19e   : > { %v635_v18 = vpop.eup %634  ;;  %636 = vrcp.f32 %v401_v17 }
 0x19f   : > { %v407_v19 = vmul.f32 %v635_v18, %v627_v57  ;;  %v412_v20 = vpack.c.bf16 %v408_v16, %v408_v16 }
 0x1a1   : > { %v411_v21 = vpack.c.bf16 %v407_v19, %v407_v19  ;;  %606 = vmatmul.msk.bf16.vlgmr.msrb.gmra.mxu2 %vm280_vm0, %v412_v20 }
 0x1a3   : > { %605 = vmatmul.msk.bf16.vlgmr.msrb.gmra.mxu1 %vm280_vm0, %v411_v21 }
 0x1a4   : > { %v637_v22 = vpop.eup %636 }
 0x1a5   : > { %v409_v23 = vmul.f32 %v637_v22, %v629_v59 }
 0x1a7   : > { %v413_v24 = vpack.c.bf16 %v409_v23, %v409_v23 }
 0x1a9   : > { %607 = vmatmul.msk.bf16.vlgmr.msrb.gmra.mxu3 %vm280_vm0, %v413_v24 }
 0x218   : > { %v430_v25 = vpop.f32.mrf.mxu0 }
 0x219   : > { %491 = vst.msk [vmem:[%s254_s7] sm:$0xff] %vm280_vm0, %v430_v25 }
 0x220   : > { %v432_v26 = vpop.f32.mrf.mxu0  ;;  %v449_v27 = vpop.f32.mrf.mxu1 }
 0x221   : > { %492 = vst.msk [vmem:[%s254_s7 + $0x8] sm:$0xff] %vm280_vm0, %v449_v27 }
 0x224   : > { %v468_v28 = vpop.f32.mrf.mxu2 }
 0x225   : > { %493 = vst.msk [vmem:[%s254_s7 + $0x10] sm:$0xff] %vm280_vm0, %v468_v28 }
 0x228   : > { %v451_v29 = vpop.f32.mrf.mxu1 }
 0x22c   : > { %v470_v30 = vpop.f32.mrf.mxu2  ;;  %v487_v31 = vpop.f32.mrf.mxu3 }
 0x22d   : > { %494 = vst.msk [vmem:[%s254_s7 + $0x18] sm:$0xff] %vm280_vm0, %v487_v31 }
 0x234   : > { %v489_v32 = vpop.f32.mrf.mxu3 }
 0x235 PF: > { %s14_s15 = sadd.s32 1, %s644_s15  }
 0x236   : > { %p11_p4 = scmp.ge.s32.totalorder %s14_s15, 4  }
 0x238   :  { %13 = sbr.rel (!%p11_p4) target bundleno = 1 (0x1), region = 75 }

// kernel: transformer_decoder_forward.21
= control target key start
LH: loop header
LB: loop body
LE: loop exit
PB: predicated region body
PF: predicated region fallthrough
CT: control target
= control target key end

     0   :  { %vm28_vm0 = vcmask 261120   ;;  %v160_v3 = vmov 0.0   ;;  %v161_v27 = vmov 32.0   ;;  %s247_s1 = inlined_call_operand.vmem [shape: f32[32,32], index: 1, kind: input, shape index: {}]   ;;  %s248_s0 = inlined_call_operand.vmem [shape: f32[16,32], index: 0, kind: input, shape index: {}]   ;;  %s249_s2 = inlined_call_operand.vmem [shape: f32[1,32], index: 2, kind: input, shape index: {}]   ;;  %s250_s3 = inlined_call_operand.vmem [shape: f32[16,32], index: 3, kind: input, shape index: {}]   ;;  %s251_s4 = inlined_call_operand.vmem [shape: f32[1,32], index: 4, kind: input, shape index: {}]   ;;  %s252_s5 = inlined_call_operand.vmem [shape: f32[1,32], index: 5, kind: input, shape index: {}]   ;;  %s253_s6 = inlined_call_operand.vmem [shape: f32[16,32], index: 6, kind: output, shape index: {}]  }
   0x1   :  { %v38_v0 = vld [vmem:[%s247_s1 + $0x10] sm:$0xff]  ;;  %v39_v1 = vld [vmem:[%s247_s1 + $0x18] sm:$0xff]  ;;  %v36_v2 = vld [vmem:[%s247_s1] sm:$0xff]  ;;  %29 = vst.msk [vmem:[#allocation2] sm:$0xff] %vm28_vm0, %v160_v3  ;;  %154 = vrcp.f32 %v161_v27 }
   0x2   :  { %v41_v4 = vpack.c.bf16 %v39_v1, %v38_v0  ;;  %v37_v5 = vld [vmem:[%s247_s1 + $0x8] sm:$0xff]  ;;  %30 = vst.msk [vmem:[#allocation2 + $0x8] sm:$0xff] %vm28_vm0, %v160_v3  ;;  %v33_v7 = vld [vmem:[%s248_s0] sm:$0xff] }
   0x3   :  { %v40_v6 = vpack.c.bf16 %v37_v5, %v36_v2  ;;  %v34_v8 = vld [vmem:[%s248_s0 + $0x8] sm:$0xff]  ;;  %v151_v14 = vld [vmem:[%s249_s2] ss:$0 sm:$0xff] }
   0x4   :  { %52 = vmatpush.bf16.msra.mxu0 %v41_v4  ;;  %v35_v9 = vpack.c.bf16 %v34_v8, %v33_v7  ;;  %v75_v18 = vld [vmem:[%s250_s3] sm:$0xff]  ;;  %v76_v23 = vld [vmem:[%s250_s3 + $0x8] sm:$0xff] }
   0x5   :  { %v152_v58 = vld [vmem:[%s251_s4] ss:$0 sm:$0xff] }
   0x6   :  { %v153_v61 = vld [vmem:[%s252_s5] ss:$0 sm:$0xff] }
   0x7   :  { %v155_v28 = vpop.eup %154 }
   0x8   :  { %53 = vmatpush.bf16.msra.mxu0 %v40_v6  ;;  %v31_v10 = vld [vmem:[#allocation2] sm:$0xff]  ;;  %v86_v29 = vmul.f32 32.0, %v155_v28  ;;  %vm90_vm1 = vweird.f32 %v155_v28 }
   0x9   :  { %v32_v13 = vld [vmem:[#allocation2 + $0x8] sm:$0xff] }
   0xa   :  { %v87_v30 = vsub.f32 1.0, %v86_v29 }
   0xb   :  { %148 = vmatmul.msk.bf16.vlgmr.msra.gmra.mxu0 %vm28_vm0, %v35_v9 }
   0xc   :  { %v88_v31 = vmul.f32 %v155_v28, %v87_v30 }
   0xe   :  { %v89_v32 = vadd.f32 %v155_v28, %v88_v31 }
  0x10   :  { %v91_v33 = vsel %vm90_vm1, %v155_v28, %v89_v32 }
  0x88   :  { %v55_v11 = vpop.f32.mrf.mxu0 }
  0x89   :  { %v60_v12 = vadd.f32 %v55_v11, %v31_v10 }
  0x8b   :  { %62 = vst.msk [vmem:[#allocation2] sm:$0xff] %vm28_vm0, %v60_v12 }
  0x90   :  { %v57_v15 = vpop.f32.mrf.mxu0 }
  0x91   :  { %v61_v16 = vadd.f32 %v57_v15, %v32_v13 }
  0x92   :  { %v67_v17 = vld [vmem:[#allocation2] sm:$0xff] }
  0x93   :  { %63 = vst.msk [vmem:[#allocation2 + $0x8] sm:$0xff] %vm28_vm0, %v61_v16  ;;  %v73_v19 = vadd.f32 %v151_v14, %v67_v17 }
  0x95   :  { %v77_v20 = vadd.f32 %v75_v18, %v73_v19 }
  0x97   :  { %v79_v21 = vsel %vm28_vm0, %v77_v20, 0.0 }
  0x98   :  { %80 = vadd.xlane.f32.xlu0 %v79_v21 }
  0x9a   :  { %v68_v22 = vld [vmem:[#allocation2 + $0x8] sm:$0xff] }
  0x9b   :  { %v74_v24 = vadd.f32 %v151_v14, %v68_v22 }
  0x9d   :  { %v78_v25 = vadd.f32 %v76_v23, %v74_v24 }
  0x9f   :  { %v82_v26 = vsel %vm28_vm0, %v78_v25, 0.0 }
  0xa0   :  { %83 = vadd.xlane.f32.xlu0 %v82_v26 }
 0x10b   :  { %v81_v34 = vpop.xlane.xlu0 %80 }
 0x10c   :  { %v92_v35 = vmul.f32 %v91_v33, %v81_v34 }
 0x10e   :  { %v94_v36 = vsub.f32 %v77_v20, %v92_v35 }
 0x110   :  { %v96_v37 = vmul.f32 %v94_v36, %v94_v36 }
 0x112   :  { %v98_v38 = vsel %vm28_vm0, %v96_v37, 0.0 }
 0x113   :  { %99 = vadd.xlane.f32.xlu1 %v98_v38  ;;  %v84_v39 = vpop.xlane.xlu0 %83 }
 0x114   :  { %v93_v40 = vmul.f32 %v91_v33, %v84_v39 }
 0x116   :  { %v95_v41 = vsub.f32 %v78_v25, %v93_v40 }
 0x118   :  { %v97_v42 = vmul.f32 %v95_v41, %v95_v41 }
 0x11a   :  { %v101_v43 = vsel %vm28_vm0, %v97_v42, 0.0 }
 0x11b   :  { %102 = vadd.xlane.f32.xlu1 %v101_v43 }
 0x186   :  { %v100_v44 = vpop.xlane.xlu1 %99 }
 0x187   :  { %v104_v45 = vmul.f32 %v100_v44, %v91_v33 }
 0x189   :  { %v106_v46 = vadd.f32 1e-05, %v104_v45 }
 0x18b   :  { %156 = vrsqrt.f32 %v106_v46  ;;  %vm114_vm3 = vweird.f32 %v106_v46 }
 0x18e   :  { %v103_v47 = vpop.xlane.xlu1 %102 }
 0x18f   :  { %v105_v48 = vmul.f32 %v103_v47, %v91_v33 }
 0x191   :  { %v157_v49 = vpop.eup %156  ;;  %v107_v50 = vadd.f32 1e-05, %v105_v48 }
 0x192   :  { %v109_v51 = vmul.f32 %v157_v49, %v106_v46  ;;  %vm115_vm2 = vweird.f32 %v157_v49 }
 0x193   :  { %158 = vrsqrt.f32 %v107_v50  ;;  %vm116_vm4 = vmor %vm114_vm3, %vm115_vm2  ;;  %vm124_vm6 = vweird.f32 %v107_v50 }
 0x194   :  { %v110_v52 = vmul.f32 %v157_v49, %v109_v51 }
 0x196   :  { %v111_v53 = vmul.f32 0.5, %v110_v52 }
 0x198   :  { %v112_v54 = vsub.f32 1.5, %v111_v53 }
 0x199   :  { %v159_v55 = vpop.eup %158 }
 0x19a   :  { %v113_v56 = vmul.f32 %v157_v49, %v112_v54  ;;  %v119_v57 = vmul.f32 %v159_v55, %v107_v50  ;;  %vm125_vm5 = vweird.f32 %v159_v55 }
 0x19b   :  { %vm126_vm7 = vmor %vm124_vm6, %vm125_vm5 }
 0x19c   :  { %v117_v59 = vsel %vm116_vm4, %v157_v49, %v113_v56  ;;  %v120_v60 = vmul.f32 %v159_v55, %v119_v57 }
 0x19d   :  { %v128_v62 = vmul.f32 %v117_v59, %v94_v36 }
 0x19e   :  { %v121_v63 = vmul.f32 0.5, %v120_v60 }
 0x19f   :  { %v134_v0 = vmul.f32 %v152_v58, %v128_v62 }
 0x1a0   :  { %v122_v1 = vsub.f32 1.5, %v121_v63 }
 0x1a1   :  { %v140_v2 = vadd.f32 %v153_v61, %v134_v0 }
 0x1a2   :  { %v123_v3 = vmul.f32 %v159_v55, %v122_v1 }
 0x1a3   :  { %142 = vst.msk [vmem:[%s253_s6] sm:$0xff] %vm28_vm0, %v140_v2 }
 0x1a4   :  { %v127_v4 = vsel %vm126_vm7, %v159_v55, %v123_v3 }
 0x1a5   :  { %v129_v5 = vmul.f32 %v127_v4, %v95_v41 }
 0x1a7   :  { %v135_v6 = vmul.f32 %v152_v58, %v129_v5 }
 0x1a9   :  { %v141_v7 = vadd.f32 %v153_v61, %v135_v6 }
 0x1ab   :  { %143 = vst.msk [vmem:[%s253_s6 + $0x8] sm:$0xff] %vm28_vm0, %v141_v7 }

// kernel: transformer_decoder_forward.23
= control target key start
LH: loop header
LB: loop body
LE: loop exit
PB: predicated region body
PF: predicated region fallthrough
CT: control target
= control target key end

     0   :  { %vm19_vm0 = vcmask 523264   ;;  %v76_v3 = vmov 0.0   ;;  %vm33_vm1 = vcmask 261120   ;;  %s130_s1 = inlined_call_operand.vmem [shape: f32[32,64], index: 1, kind: input, shape index: {}]   ;;  %s131_s0 = inlined_call_operand.vmem [shape: f32[16,32], index: 0, kind: input, shape index: {}]   ;;  %s132_s2 = inlined_call_operand.vmem [shape: f32[1,64], index: 2, kind: input, shape index: {}]   ;;  %s133_s3 = inlined_call_operand.vmem [shape: f32[16,64], index: 3, kind: output, shape index: {}]  }
   0x1   :  { %v29_v0 = vld [vmem:[%s130_s1 + $0x10] sm:$0xff]  ;;  %v30_v1 = vld [vmem:[%s130_s1 + $0x18] sm:$0xff]  ;;  %v27_v2 = vld [vmem:[%s130_s1] sm:$0xff]  ;;  %20 = vst.msk [vmem:[#allocation2] sm:$0xff] %vm19_vm0, %v76_v3 }
   0x2   :  { %v32_v4 = vpack.c.bf16 %v30_v1, %v29_v0  ;;  %v28_v5 = vld [vmem:[%s130_s1 + $0x8] sm:$0xff]  ;;  %21 = vst.msk [vmem:[#allocation2 + $0x8] sm:$0xff] %vm19_vm0, %v76_v3  ;;  %v24_v7 = vld [vmem:[%s131_s0] sm:$0xff] }
   0x3   :  { %v31_v6 = vpack.c.bf16 %v28_v5, %v27_v2  ;;  %v25_v8 = vld [vmem:[%s131_s0 + $0x8] sm:$0xff]  ;;  %v75_v14 = vld [vmem:[%s132_s2] ss:$0 sm:$0xff] }
   0x4   :  { %43 = vmatpush.bf16.msra.mxu0 %v32_v4  ;;  %v26_v9 = vpack.c.bf16 %v25_v8, %v24_v7 }
   0x8   :  { %44 = vmatpush.bf16.msra.mxu0 %v31_v6  ;;  %v22_v10 = vld [vmem:[#allocation2] sm:$0xff] }
   0x9   :  { %v23_v13 = vld [vmem:[#allocation2 + $0x8] sm:$0xff] }
   0xb   :  { %73 = vmatmul.msk.bf16.vlgmr.msra.gmra.mxu0 %vm33_vm1, %v26_v9 }
  0x88   :  { %v46_v11 = vpop.f32.mrf.mxu0 }
  0x89   :  { %v51_v12 = vadd.f32 %v46_v11, %v22_v10 }
  0x8b   :  { %54 = vst.msk [vmem:[#allocation2] sm:$0xff] %vm19_vm0, %v51_v12 }
  0x90   :  { %v48_v15 = vpop.f32.mrf.mxu0 }
  0x91   :  { %v52_v16 = vadd.f32 %v48_v15, %v23_v13 }
  0x92   :  { %v59_v17 = vld [vmem:[#allocation2] sm:$0xff] }
  0x93   :  { %v65_v18 = vadd.f32 %v75_v14, %v59_v17  ;;  %55 = vst.msk [vmem:[#allocation2 + $0x8] sm:$0xff] %vm19_vm0, %v52_v16 }
  0x95   :  { %67 = vst.msk [vmem:[%s133_s3] sm:$0xff] %vm19_vm0, %v65_v18 }
  0x9a   :  { %v60_v19 = vld [vmem:[#allocation2 + $0x8] sm:$0xff] }
  0x9b   :  { %v66_v20 = vadd.f32 %v75_v14, %v60_v19 }
  0x9d   :  { %68 = vst.msk [vmem:[%s133_s3 + $0x8] sm:$0xff] %vm19_vm0, %v66_v20 }

// kernel: transformer_decoder_forward.26
= control target key start
LH: loop header
LB: loop body
LE: loop exit
PB: predicated region body
PF: predicated region fallthrough
CT: control target
= control target key end

     0   :  { %vm19_vm0 = vcmask 523264   ;;  %v78_v3 = vmov 0.0   ;;  %vm33_vm1 = vcmask 261120   ;;  %s132_s1 = inlined_call_operand.vmem [shape: f32[32,64], index: 1, kind: input, shape index: {}]   ;;  %s133_s0 = inlined_call_operand.vmem [shape: f32[16,32], index: 0, kind: input, shape index: {}]   ;;  %s134_s2 = inlined_call_operand.vmem [shape: f32[1,64], index: 2, kind: input, shape index: {}]   ;;  %s135_s3 = inlined_call_operand.vmem [shape: f32[16,64], index: 3, kind: output, shape index: {}]  }
   0x1   :  { %v29_v0 = vld [vmem:[%s132_s1 + $0x10] sm:$0xff]  ;;  %v30_v1 = vld [vmem:[%s132_s1 + $0x18] sm:$0xff]  ;;  %v27_v2 = vld [vmem:[%s132_s1] sm:$0xff]  ;;  %20 = vst.msk [vmem:[#allocation2] sm:$0xff] %vm19_vm0, %v78_v3 }
   0x2   :  { %v32_v4 = vpack.c.bf16 %v30_v1, %v29_v0  ;;  %v28_v5 = vld [vmem:[%s132_s1 + $0x8] sm:$0xff]  ;;  %21 = vst.msk [vmem:[#allocation2 + $0x8] sm:$0xff] %vm19_vm0, %v78_v3  ;;  %v24_v7 = vld [vmem:[%s133_s0] sm:$0xff] }
   0x3   :  { %v31_v6 = vpack.c.bf16 %v28_v5, %v27_v2  ;;  %v25_v8 = vld [vmem:[%s133_s0 + $0x8] sm:$0xff]  ;;  %v77_v14 = vld [vmem:[%s134_s2] ss:$0 sm:$0xff] }
   0x4   :  { %43 = vmatpush.bf16.msra.mxu0 %v32_v4  ;;  %v26_v9 = vpack.c.bf16 %v25_v8, %v24_v7 }
   0x8   :  { %44 = vmatpush.bf16.msra.mxu0 %v31_v6  ;;  %v22_v10 = vld [vmem:[#allocation2] sm:$0xff] }
   0x9   :  { %v23_v13 = vld [vmem:[#allocation2 + $0x8] sm:$0xff] }
   0xb   :  { %75 = vmatmul.msk.bf16.vlgmr.msra.gmra.mxu0 %vm33_vm1, %v26_v9 }
  0x88   :  { %v46_v11 = vpop.f32.mrf.mxu0 }
  0x89   :  { %v51_v12 = vadd.f32 %v46_v11, %v22_v10 }
  0x8b   :  { %54 = vst.msk [vmem:[#allocation2] sm:$0xff] %vm19_vm0, %v51_v12 }
  0x90   :  { %v48_v15 = vpop.f32.mrf.mxu0 }
  0x91   :  { %v52_v16 = vadd.f32 %v48_v15, %v23_v13 }
  0x92   :  { %v59_v17 = vld [vmem:[#allocation2] sm:$0xff] }
  0x93   :  { %v65_v18 = vadd.f32 %v77_v14, %v59_v17  ;;  %55 = vst.msk [vmem:[#allocation2 + $0x8] sm:$0xff] %vm19_vm0, %v52_v16 }
  0x95   :  { %v67_v19 = vmax.f32 %v65_v18, 0.0 }
  0x97   :  { %69 = vst.msk [vmem:[%s135_s3] sm:$0xff] %vm19_vm0, %v67_v19 }
  0x9a   :  { %v60_v20 = vld [vmem:[#allocation2 + $0x8] sm:$0xff] }
  0x9b   :  { %v66_v21 = vadd.f32 %v77_v14, %v60_v20 }
  0x9d   :  { %v68_v22 = vmax.f32 %v66_v21, 0.0 }
  0x9f   :  { %70 = vst.msk [vmem:[%s135_s3 + $0x8] sm:$0xff] %vm19_vm0, %v68_v22 }

// kernel: transformer_decoder_forward.37
= control target key start
LH: loop header
LB: loop body
LE: loop exit
PB: predicated region body
PF: predicated region fallthrough
CT: control target
= control target key end

     0   :  { %vm20_vm0 = vcmask 523264   ;;  %v120_v5 = vmov 0.0   ;;  %s174_s0 = inlined_call_operand.vmem [shape: f32[16,32], index: 0, kind: input, shape index: {}]   ;;  %s175_s1 = inlined_call_operand.vmem [shape: f32[32,64], index: 1, kind: input, shape index: {}]   ;;  %s176_s2 = inlined_call_operand.vmem [shape: f32[1,64], index: 2, kind: input, shape index: {}]   ;;  %s177_s3 = inlined_call_operand.hbm [shape: f32[16,64], index: 3, kind: output, shape index: {}]  }
   0x1   :  { %v30_v0 = vld [vmem:[%s175_s1 + $0x10] sm:$0xff]  ;;  %v31_v1 = vld [vmem:[%s175_s1 + $0x18] sm:$0xff]  ;;  %v28_v2 = vld [vmem:[%s175_s1] sm:$0xff]  ;;  %21 = vst.msk [vmem:[#allocation2] sm:$0xff] %vm20_vm0, %v120_v5 }
   0x2   :  { %v33_v3 = vpack.c.bf16 %v31_v1, %v30_v0  ;;  %v29_v4 = vld [vmem:[%s175_s1 + $0x8] sm:$0xff]  ;;  %22 = vst.msk [vmem:[#allocation2 + $0x8] sm:$0xff] %vm20_vm0, %v120_v5 }
   0x3   :  { %8 = vsyncpa [#allocation4], 0  ;;  %v32_v6 = vpack.c.bf16 %v29_v4, %v28_v2  ;;  %v25_v7 = vld [vmem:[%s174_s0] sm:$0xff]  ;;  %v26_v8 = vld [vmem:[%s174_s0 + $0x8] sm:$0xff]  ;;  %vm34_vm1 = vcmask 261120   ;;  %s121_s0 = smov [#allocation3]  }
   0x4   :  { %44 = vmatpush.bf16.msra.mxu0 %v33_v3  ;;  %v27_v9 = vpack.c.bf16 %v26_v8, %v25_v7  ;;  %v93_v14 = vld [vmem:[%s176_s2] ss:$0 sm:$0xff]  ;;  %s74_s25 = sshll.u32 %s121_s0, 4  ;;  %s76_s28 = sshll.u32 %s177_s3, 4  ;;  %s75_s25 = int_to_ptr.vmem [resolvable:$true] %s74_s25  ;;  %s77_s28 = int_to_ptr.hbm [resolvable:$true] %s76_s28 }
   0x5   :  { %s122_s2 = smov 128   ;;  %s123_s29 = smov 8  }
   0x8   :  { %45 = vmatpush.bf16.msra.mxu0 %v32_v6  ;;  %v23_v10 = vld [vmem:[#allocation2] sm:$0xff] }
   0x9   :  { %v24_v13 = vld [vmem:[#allocation2 + $0x8] sm:$0xff] }
   0xb   :  { %88 = vmatmul.msk.bf16.vlgmr.msra.gmra.mxu0 %vm34_vm1, %v27_v9 }
  0x88   :  { %v47_v11 = vpop.f32.mrf.mxu0 }
  0x89   :  { %v52_v12 = vadd.f32 %v47_v11, %v23_v10 }
  0x8b   :  { %55 = vst.msk [vmem:[#allocation2] sm:$0xff] %vm20_vm0, %v52_v12 }
  0x90   :  { %v49_v15 = vpop.f32.mrf.mxu0 }
  0x91   :  { %v53_v16 = vadd.f32 %v49_v15, %v24_v13 }
  0x92   :  { %v60_v17 = vld [vmem:[#allocation2] sm:$0xff] }
  0x93   :  { %56 = vst.msk [vmem:[#allocation2 + $0x8] sm:$0xff] %vm20_vm0, %v53_v16  ;;  %v66_v18 = vadd.f32 %v93_v14, %v60_v17 }
  0x95   :  { %68 = vst.msk [vmem:[#allocation3] sm:$0xff] %vm20_vm0, %v66_v18 }
  0x9a   :  { %v61_v19 = vld [vmem:[#allocation2 + $0x8] sm:$0xff] }
  0x9b   :  { %v67_v20 = vadd.f32 %v93_v14, %v61_v19 }
  0x9d   :  { %69 = vst.msk [vmem:[#allocation3 + $0x8] sm:$0xff] %vm20_vm0, %v67_v20 }
  0x9e   :  { %82 = dma.vmem_to_hbm [thread:$0]  %s75_s25, 256, %s77_s28, [#allocation4], %s122_s2, %s122_s2, %s123_s29  }
  0x9f   :  { %118 = dma.done.wait [#allocation4], 256  }
  0xa0   :  { %119 = vsyncadd [#allocation4], 4294967040 }
  0xa1   :  { %87 = vsyncpa [#allocation4], 1 }

// kernel: transformer_decoder_forward.27
= control target key start
LH: loop header
LB: loop body
LE: loop exit
PB: predicated region body
PF: predicated region fallthrough
CT: control target
= control target key end

     0   :  { %vm28_vm0 = vcmask 261120   ;;  %v167_v3 = vmov 0.0   ;;  %vm48_vm1 = vcmask 523264   ;;  %v168_v33 = vmov 32.0   ;;  %s265_s1 = inlined_call_operand.vmem [shape: f32[64,32], index: 1, kind: input, shape index: {}]   ;;  %s266_s0 = inlined_call_operand.vmem [shape: f32[16,64], index: 0, kind: input, shape index: {}]   ;;  %s267_s2 = inlined_call_operand.vmem [shape: f32[1,32], index: 2, kind: input, shape index: {}]   ;;  %s268_s3 = inlined_call_operand.vmem [shape: f32[16,32], index: 3, kind: input, shape index: {}]   ;;  %s269_s4 = inlined_call_operand.vmem [shape: f32[1,32], index: 4, kind: input, shape index: {}]   ;;  %s270_s5 = inlined_call_operand.vmem [shape: f32[1,32], index: 5, kind: input, shape index: {}]   ;;  %s271_s6 = inlined_call_operand.vmem [shape: f32[16,32], index: 6, kind: output, shape index: {}]  }
   0x1   :  { %v42_v0 = vld [vmem:[%s265_s1 + $0x30] sm:$0xff]  ;;  %v43_v1 = vld [vmem:[%s265_s1 + $0x38] sm:$0xff]  ;;  %v40_v2 = vld [vmem:[%s265_s1 + $0x20] sm:$0xff]  ;;  %29 = vst.msk [vmem:[#allocation2] sm:$0xff] %vm28_vm0, %v167_v3  ;;  %161 = vrcp.f32 %v168_v33 }
   0x2   :  { %v47_v4 = vpack.c.bf16 %v43_v1, %v42_v0  ;;  %v41_v5 = vld [vmem:[%s265_s1 + $0x28] sm:$0xff]  ;;  %30 = vst.msk [vmem:[#allocation2 + $0x8] sm:$0xff] %vm28_vm0, %v167_v3  ;;  %v38_v7 = vld [vmem:[%s265_s1 + $0x10] sm:$0xff]  ;;  %v39_v8 = vld [vmem:[%s265_s1 + $0x18] sm:$0xff] }
   0x3   :  { %v46_v6 = vpack.c.bf16 %v41_v5, %v40_v2  ;;  %v45_v9 = vpack.c.bf16 %v39_v8, %v38_v7  ;;  %v36_v10 = vld [vmem:[%s265_s1] sm:$0xff]  ;;  %v37_v11 = vld [vmem:[%s265_s1 + $0x8] sm:$0xff] }
   0x4   :  { %56 = vmatpush.bf16.msra.mxu0 %v47_v4  ;;  %v44_v12 = vpack.c.bf16 %v37_v11, %v36_v10  ;;  %v33_v13 = vld [vmem:[%s266_s0] sm:$0xff]  ;;  %v34_v14 = vld [vmem:[%s266_s0 + $0x8] sm:$0xff] }
   0x5   :  { %v35_v15 = vpack.c.bf16 %v34_v14, %v33_v13  ;;  %v158_v20 = vld [vmem:[%s267_s2] ss:$0 sm:$0xff]  ;;  %v83_v29 = vld [vmem:[%s268_s3 + $0x8] sm:$0xff] }
   0x6   :  { %v82_v24 = vld [vmem:[%s268_s3] sm:$0xff] }
   0x7   :  { %v162_v34 = vpop.eup %161  ;;  %v159_v0 = vld [vmem:[%s269_s4] ss:$0 sm:$0xff] }
   0x8   :  { %57 = vmatpush.bf16.msra.mxu0 %v46_v6  ;;  %v31_v16 = vld [vmem:[#allocation2] sm:$0xff]  ;;  %v93_v35 = vmul.f32 32.0, %v162_v34  ;;  %vm97_vm2 = vweird.f32 %v162_v34 }
   0x9   :  { %v32_v19 = vld [vmem:[#allocation2 + $0x8] sm:$0xff]  ;;  %v160_v3 = vld [vmem:[%s270_s5] ss:$0 sm:$0xff] }
   0xa   :  { %v94_v36 = vsub.f32 1.0, %v93_v35 }
   0xc   :  { %58 = vmatpush.bf16.msra.mxu0 %v45_v9  ;;  %v95_v37 = vmul.f32 %v162_v34, %v94_v36 }
   0xe   :  { %v96_v38 = vadd.f32 %v162_v34, %v95_v37 }
  0x10   :  { %59 = vmatpush.bf16.msra.mxu0 %v44_v12  ;;  %v98_v39 = vsel %vm97_vm2, %v162_v34, %v96_v38 }
  0x13   :  { %155 = vmatmul.msk.bf16.vlgmr.msra.gmra.mxu0 %vm48_vm1, %v35_v15 }
  0x90   :  { %v61_v17 = vpop.f32.mrf.mxu0 }
  0x91   :  { %v66_v18 = vadd.f32 %v61_v17, %v31_v16 }
  0x93   :  { %69 = vst.msk [vmem:[#allocation2] sm:$0xff] %vm28_vm0, %v66_v18 }
  0x98   :  { %v63_v21 = vpop.f32.mrf.mxu0 }
  0x99   :  { %v67_v22 = vadd.f32 %v63_v21, %v32_v19 }
  0x9a   :  { %v74_v23 = vld [vmem:[#allocation2] sm:$0xff] }
  0x9b   :  { %70 = vst.msk [vmem:[#allocation2 + $0x8] sm:$0xff] %vm28_vm0, %v67_v22  ;;  %v80_v25 = vadd.f32 %v158_v20, %v74_v23 }
  0x9d   :  { %v84_v26 = vadd.f32 %v82_v24, %v80_v25 }
  0x9f   :  { %v86_v27 = vsel %vm28_vm0, %v84_v26, 0.0 }
  0xa0   :  { %87 = vadd.xlane.f32.xlu0 %v86_v27 }
  0xa2   :  { %v75_v28 = vld [vmem:[#allocation2 + $0x8] sm:$0xff] }
  0xa3   :  { %v81_v30 = vadd.f32 %v158_v20, %v75_v28 }
  0xa5   :  { %v85_v31 = vadd.f32 %v83_v29, %v81_v30 }
  0xa7   :  { %v89_v32 = vsel %vm28_vm0, %v85_v31, 0.0 }
  0xa8   :  { %90 = vadd.xlane.f32.xlu0 %v89_v32 }
 0x113   :  { %v88_v40 = vpop.xlane.xlu0 %87 }
 0x114   :  { %v99_v41 = vmul.f32 %v98_v39, %v88_v40 }
 0x116   :  { %v101_v42 = vsub.f32 %v84_v26, %v99_v41 }
 0x118   :  { %v103_v43 = vmul.f32 %v101_v42, %v101_v42 }
 0x11a   :  { %v105_v44 = vsel %vm28_vm0, %v103_v43, 0.0 }
 0x11b   :  { %106 = vadd.xlane.f32.xlu1 %v105_v44  ;;  %v91_v45 = vpop.xlane.xlu0 %90 }
 0x11c   :  { %v100_v46 = vmul.f32 %v98_v39, %v91_v45 }
 0x11e   :  { %v102_v47 = vsub.f32 %v85_v31, %v100_v46 }
 0x120   :  { %v104_v48 = vmul.f32 %v102_v47, %v102_v47 }
 0x122   :  { %v108_v49 = vsel %vm28_vm0, %v104_v48, 0.0 }
 0x123   :  { %109 = vadd.xlane.f32.xlu1 %v108_v49 }
 0x18e   :  { %v107_v50 = vpop.xlane.xlu1 %106 }
 0x18f   :  { %v111_v51 = vmul.f32 %v107_v50, %v98_v39 }
 0x191   :  { %v113_v52 = vadd.f32 1e-05, %v111_v51 }
 0x193   :  { %163 = vrsqrt.f32 %v113_v52  ;;  %vm121_vm4 = vweird.f32 %v113_v52 }
 0x196   :  { %v110_v53 = vpop.xlane.xlu1 %109 }
 0x197   :  { %v112_v54 = vmul.f32 %v110_v53, %v98_v39 }
 0x199   :  { %v164_v55 = vpop.eup %163  ;;  %v114_v56 = vadd.f32 1e-05, %v112_v54 }
 0x19a   :  { %v116_v57 = vmul.f32 %v164_v55, %v113_v52  ;;  %vm122_vm3 = vweird.f32 %v164_v55 }
 0x19b   :  { %165 = vrsqrt.f32 %v114_v56  ;;  %vm123_vm5 = vmor %vm121_vm4, %vm122_vm3  ;;  %vm131_vm7 = vweird.f32 %v114_v56 }
 0x19c   :  { %v117_v58 = vmul.f32 %v164_v55, %v116_v57 }
 0x19e   :  { %v118_v59 = vmul.f32 0.5, %v117_v58 }
 0x1a0   :  { %v119_v60 = vsub.f32 1.5, %v118_v59 }
 0x1a1   :  { %v166_v61 = vpop.eup %165 }
 0x1a2   :  { %v120_v62 = vmul.f32 %v164_v55, %v119_v60  ;;  %v126_v63 = vmul.f32 %v166_v61, %v114_v56  ;;  %vm132_vm6 = vweird.f32 %v166_v61 }
 0x1a3   :  { %vm133_vm8 = vmor %vm131_vm7, %vm132_vm6 }
 0x1a4   :  { %v124_v1 = vsel %vm123_vm5, %v164_v55, %v120_v62  ;;  %v127_v2 = vmul.f32 %v166_v61, %v126_v63 }
 0x1a5   :  { %v135_v4 = vmul.f32 %v124_v1, %v101_v42 }
 0x1a6   :  { %v128_v5 = vmul.f32 0.5, %v127_v2 }
 0x1a7   :  { %v141_v6 = vmul.f32 %v159_v0, %v135_v4 }
 0x1a8   :  { %v129_v7 = vsub.f32 1.5, %v128_v5 }
 0x1a9   :  { %v147_v8 = vadd.f32 %v160_v3, %v141_v6 }
 0x1aa   :  { %v130_v9 = vmul.f32 %v166_v61, %v129_v7 }
 0x1ab   :  { %149 = vst.msk [vmem:[%s271_s6] sm:$0xff] %vm28_vm0, %v147_v8 }
 0x1ac   :  { %v134_v10 = vsel %vm133_vm8, %v166_v61, %v130_v9 }
 0x1ad   :  { %v136_v11 = vmul.f32 %v134_v10, %v102_v47 }
 0x1af   :  { %v142_v12 = vmul.f32 %v159_v0, %v136_v11 }
 0x1b1   :  { %v148_v13 = vadd.f32 %v160_v3, %v142_v12 }
 0x1b3   :  { %150 = vst.msk [vmem:[%s271_s6 + $0x8] sm:$0xff] %vm28_vm0, %v148_v13 }

</bundles_post_ra>
